<compile_context>
chip_gen: v7x
topology: tpu7x:2x2x1
jax: 0.10.0
libtpu: 0.0.40
codegen_flags: <defaults>
</compile_context>

<pallas_src>
import functools

import jax
import jax.numpy as jnp
from jax.experimental import pallas as pl
from jax.experimental.pallas import tpu as pltpu

# ------------------------- model dimensions (small) -------------------------
N = 2            # batch (videos)
M = 2            # clips per video
IMG_FEAT = 256   # img_feat_dim   (2048 in the original module)
TXT_FEAT = 128   # text_feat_dim  (512 in the original module)
FD = 128         # feature_dim    (256 in the original module)
HID = 2 * FD     # MLP hidden width
H = W = 8        # spatial size of backbone feature map
T = 8            # word2vec tokens per video
INIT_STD = 0.01

BN_EPS = 1e-5
NRM_EPS = 1e-12

N_SPATIAL_CHUNKS = 2   # reduction tiling of the (M*H*W) spatial axis


def _matcher_kernel(dims,
                    imgs_ref, w2v_ref, wt_ref,
                    va_ref, vb_ref, ta_ref, tb_ref,
                    o_ref, pool_acc):
    n, t, img_feat, txt_feat, hid, fd, s_total = dims
    branch = pl.program_id(0)              # 0 = video encoder, 1 = text encoder
    chunk = pl.program_id(1)               # spatial-chunk reduction axis
    last_chunk = pl.num_programs(1) - 1

    def mlp(x_bf16, w1, b1, g, bt, w2, b2):
        # Linear -> BatchNorm1d (train-mode batch stats) -> ReLU -> Linear
        h = jnp.dot(x_bf16, w1, preferred_element_type=jnp.float32) + b1
        mu = jnp.mean(h, axis=0, keepdims=True)
        var = jnp.mean((h - mu) * (h - mu), axis=0, keepdims=True)
        h = (h - mu) * jax.lax.rsqrt(var + BN_EPS) * g + bt
        h = jnp.maximum(h, 0.0)
        return jnp.dot(h.astype(jnp.bfloat16), w2,
                       preferred_element_type=jnp.float32) + b2

    def l2_normalize(x):  # F.normalize(dim=1), eps=1e-12
        ss = jnp.sum(x * x, axis=1, keepdims=True)
        return x * jax.lax.rsqrt(jnp.maximum(ss, NRM_EPS * NRM_EPS))

    # ------------------------- video branch -------------------------
    @pl.when(branch == 0)
    def _video():
        @pl.when(chunk == 0)
        def _init():
            pool_acc[...] = jnp.zeros_like(pool_acc)

        # spatial+clip pooling: C on the lane axis -> cheap sublane reduce,
        # accumulated in f32 across spatial chunks.
        pool_acc[...] += jnp.sum(imgs_ref[...].astype(jnp.float32), axis=1)

        @pl.when(chunk == last_chunk)
        def _finalize():
            x = pool_acc[...] * (1.0 / float(s_total))       # (N, IMG_FEAT)
            v = mlp(x.astype(jnp.bfloat16),
                    va_ref[0:img_feat, :],                                    # iw1 (bf16)
                    va_ref[img_feat:img_feat + 1, :].astype(jnp.float32),     # ib1
                    va_ref[img_feat + 1:img_feat + 2, :].astype(jnp.float32), # gamma
                    va_ref[img_feat + 2:img_feat + 3, :].astype(jnp.float32), # beta
                    vb_ref[0:hid, :],                                         # iw2 (bf16)
                    vb_ref[hid:hid + 1, :].astype(jnp.float32))               # ib2
            o_ref[...] = l2_normalize(v)

    # ------------------------- text branch --------------------------
    @pl.when(branch == 1)
    def _text():
        @pl.when(chunk == last_chunk)
        def _run():
            # F.normalize(weight, p=1, dim=1)
            w = wt_ref[...]                                  # (N, T) f32
            w = w / jnp.maximum(jnp.sum(jnp.abs(w), axis=1, keepdims=True),
                                NRM_EPS)
            tf = mlp(w2v_ref[...],                                            # (N*T, TXT_FEAT) bf16
                     ta_ref[0:txt_feat, :],
                     ta_ref[txt_feat:txt_feat + 1, :].astype(jnp.float32),
                     ta_ref[txt_feat + 1:txt_feat + 2, :].astype(jnp.float32),
                     ta_ref[txt_feat + 2:txt_feat + 3, :].astype(jnp.float32),
                     tb_ref[0:hid, :],
                     tb_ref[hid:hid + 1, :].astype(jnp.float32))              # (N*T, FD)
            tf3 = tf.reshape(n, t, fd)
            # weighted token sum on the MXU: (N,1,T) @ (N,T,FD) -> (N,1,FD)
            t_feat = jax.lax.dot_general(
                w.reshape(n, 1, t), tf3,
                dimension_numbers=(((2,), (1,)), ((0,), (0,))),
                preferred_element_type=jnp.float32).reshape(n, fd)
            o_ref[...] = l2_normalize(t_feat)


def video_word2vec_matcher(imgs, word2vec, weight, params,
                           n_spatial_chunks=N_SPATIAL_CHUNKS):
    """imgs: (N, M, C, H, W) backbone feature maps; word2vec: (N, T, TXT_FEAT);
    weight: (N, T). Returns (v_feat, t_feat, sim)."""
    n, m, c, h, w = imgs.shape
    t, txt_feat = word2vec.shape[1], word2vec.shape[2]
    img_feat = c
    hid = params["iw1"].shape[1]
    fd = params["iw2"].shape[1]
    s_total = m * h * w

    # channel-last, bf16 activations: C on the 128-lane axis.
    imgs_k = jnp.transpose(imgs, (0, 1, 3, 4, 2)).reshape(
        n, s_total, c).astype(jnp.bfloat16)
    w2v_k = word2vec.reshape(n * t, txt_feat).astype(jnp.bfloat16)
    wt_k = weight.astype(jnp.float32)

    # packed parameter slabs (bf16): [W1 ; b1 ; gamma ; beta], [W2 ; b2]
    va = jnp.concatenate([params["iw1"], params["ib1"], params["ig"],
                          params["ibt"]], axis=0).astype(jnp.bfloat16)
    vb = jnp.concatenate([params["iw2"], params["ib2"]],
                         axis=0).astype(jnp.bfloat16)
    ta = jnp.concatenate([params["tw1"], params["tb1"], params["tg"],
                          params["tbt"]], axis=0).astype(jnp.bfloat16)
    tb = jnp.concatenate([params["tw2"], params["tb2"]],
                         axis=0).astype(jnp.bfloat16)

    sc = n_spatial_chunks
    if s_total % sc != 0 or (s_total // sc) % 8 != 0:
        sc = 1
    chunk_s = s_total // sc

    dims = (n, t, img_feat, txt_feat, hid, fd, s_total)
    kernel = functools.partial(_matcher_kernel, dims)

    # video branch (b=0) walks spatial chunks; text branch (b=1) pins the last
    # chunk so the block index does not change when crossing branches.
    def imgs_index_map(b, s):
        return (0, s * (1 - b) + (sc - 1) * b, 0)

    grid_spec = pltpu.PrefetchScalarGridSpec(
        num_scalar_prefetch=0,
        grid=(2, sc),                       # (branch, spatial chunk)
        in_specs=[
            pl.BlockSpec((n, chunk_s, c), imgs_index_map),
            pl.BlockSpec((n * t, txt_feat), lambda b, s: (0, 0)),
            pl.BlockSpec((n, t), lambda b, s: (0, 0)),
            pl.BlockSpec(va.shape, lambda b, s: (0, 0)),
            pl.BlockSpec(vb.shape, lambda b, s: (0, 0)),
            pl.BlockSpec(ta.shape, lambda b, s: (0, 0)),
            pl.BlockSpec(tb.shape, lambda b, s: (0, 0)),
        ],
        # lane-dense stacked output: branch 0 -> lanes [0:FD], branch 1 -> [FD:2FD]
        out_specs=pl.BlockSpec((n, fd), lambda b, s: (0, b)),
        scratch_shapes=[pltpu.VMEM((n, img_feat), jnp.float32)],
    )

    feats = pl.pallas_call(
        kernel,
        out_shape=jax.ShapeDtypeStruct((n, 2 * fd), jnp.float32),
        grid_spec=grid_spec,
        compiler_params=pltpu.CompilerParams(
            dimension_semantics=("parallel", "arbitrary")),
    )(imgs_k, w2v_k, wt_k, va, vb, ta, tb)

    v_feat = feats[:, :fd]
    t_feat = feats[:, fd:]
    # TODO(synk): stand-in for the registered `head`: pairwise similarity logits.
    sim = jnp.dot(v_feat, t_feat.T)
    return v_feat, t_feat, sim


def make_params(key):
    ks = jax.random.split(key, 4)
    return {
        # img_mlp: Linear(IMG_FEAT, HID) -> BN(HID) -> ReLU -> Linear(HID, FD)
        "iw1": INIT_STD * jax.random.normal(ks[0], (IMG_FEAT, HID), jnp.float32),
        "ib1": jnp.zeros((1, HID), jnp.float32),
        "ig":  jnp.ones((1, HID), jnp.float32),
        "ibt": jnp.zeros((1, HID), jnp.float32),
        "iw2": INIT_STD * jax.random.normal(ks[1], (HID, FD), jnp.float32),
        "ib2": jnp.zeros((1, FD), jnp.float32),
        # text_mlp: Linear(TXT_FEAT, HID) -> BN(HID) -> ReLU -> Linear(HID, FD)
        "tw1": INIT_STD * jax.random.normal(ks[2], (TXT_FEAT, HID), jnp.float32),
        "tb1": jnp.zeros((1, HID), jnp.float32),
        "tg":  jnp.ones((1, HID), jnp.float32),
        "tbt": jnp.zeros((1, HID), jnp.float32),
        "tw2": INIT_STD * jax.random.normal(ks[3], (HID, FD), jnp.float32),
        "tb2": jnp.zeros((1, FD), jnp.float32),
    }


def reference_forward(imgs, word2vec, weight, params):
    """Pure-JAX reference applying the same bf16 casts the kernel uses."""
    bf = lambda a: a.astype(jnp.bfloat16).astype(jnp.float32)
    n, m, c, h, w = imgs.shape
    t = word2vec.shape[1]
    fd = params["iw2"].shape[1]

    def mlp(x, w1, b1, g, bt, w2, b2):
        hh = bf(x) @ bf(w1) + bf(b1)
        mu = hh.mean(0, keepdims=True)
        var = ((hh - mu) ** 2).mean(0, keepdims=True)
        hh = (hh - mu) / jnp.sqrt(var + BN_EPS) * bf(g) + bf(bt)
        hh = jnp.maximum(hh, 0.0)
        return bf(hh) @ bf(w2) + bf(b2)

    x = bf(imgs).transpose(0, 1, 3, 4, 2).reshape(n, m * h * w, c).mean(axis=1)
    v = mlp(x, params["iw1"], params["ib1"], params["ig"], params["ibt"],
            params["iw2"], params["ib2"])
    v = v / jnp.maximum(jnp.linalg.norm(v, axis=1, keepdims=True), NRM_EPS)

    wgt = weight / jnp.maximum(jnp.sum(jnp.abs(weight), axis=1, keepdims=True),
                               NRM_EPS)
    tok = bf(word2vec).reshape(n * t, -1)
    tf = mlp(tok, params["tw1"], params["tb1"], params["tg"], params["tbt"],
             params["tw2"], params["tb2"])
    tf = (tf.reshape(n, t, fd) * wgt[:, :, None]).sum(axis=1)
    tf = tf / jnp.maximum(jnp.linalg.norm(tf, axis=1, keepdims=True), NRM_EPS)
    return v, tf


if __name__ == "__main__":
    key = jax.random.PRNGKey(0)
    k_imgs, k_w2v, k_wt, k_par = jax.random.split(key, 4)

    imgs = jax.random.normal(k_imgs, (N, M, IMG_FEAT, H, W), jnp.float32)
    word2vec = jax.random.normal(k_w2v, (N, T, TXT_FEAT), jnp.float32)
    weight = jax.random.uniform(k_wt, (N, T), jnp.float32, minval=0.1, maxval=1.0)
    params = make_params(k_par)

    v_feat, t_feat, sim = video_word2vec_matcher(imgs, word2vec, weight, params)
    jax.block_until_ready((v_feat, t_feat, sim))

    # correctness: finite, L2-normalized rows, and matches pure-JAX reference
    v_ref, t_ref = reference_forward(imgs, word2vec, weight, params)
    assert bool(jnp.all(jnp.isfinite(v_feat))) and bool(jnp.all(jnp.isfinite(t_feat)))
    assert bool(jnp.allclose(jnp.linalg.norm(v_feat, axis=1), 1.0, atol=1e-3))
    assert bool(jnp.allclose(jnp.linalg.norm(t_feat, axis=1), 1.0, atol=1e-3))
    assert bool(jnp.allclose(v_feat, v_ref, atol=1e-2))
    assert bool(jnp.allclose(t_feat, t_ref, atol=1e-2))
    assert sim.shape == (N, N)

    print("KERNEL_OK")
</pallas_src>

<mosaic_0001>
module attributes {stable_mosaic.version = 11 : i64} {
  func.func @_matcher_kernel(%arg0: i32, %arg1: i32, %arg2: memref<2x64x256xbf16, #tpu.memory_space<vmem>>, %arg3: memref<16x128xbf16, #tpu.memory_space<vmem>>, %arg4: memref<2x8xf32, #tpu.memory_space<vmem>>, %arg5: memref<259x256xbf16, #tpu.memory_space<vmem>>, %arg6: memref<257x128xbf16, #tpu.memory_space<vmem>>, %arg7: memref<131x256xbf16, #tpu.memory_space<vmem>>, %arg8: memref<257x128xbf16, #tpu.memory_space<vmem>>, %arg9: memref<2x128xf32, #tpu.memory_space<vmem>>, %arg10: memref<2x256xf32, #tpu.memory_space<vmem>>) attributes {dimension_semantics = [#tpu.dimension_semantics<parallel>, #tpu.dimension_semantics<arbitrary>], iteration_bounds = array<i64: 2, 2>, scalar_prefetch = 0 : i64, scratch_operands = 1 : i64, tpu.core_type = #tpu.core_type<tc>, window_params = [{transform_indices = @transform_0, window_bounds = array<i64: 2, 64, 256>}, {pipeline_mode = #tpu.pipeline_mode<synchronous>, transform_indices = @transform_1, window_bounds = array<i64: 16, 128>}, {pipeline_mode = #tpu.pipeline_mode<synchronous>, transform_indices = @transform_2, window_bounds = array<i64: 2, 8>}, {pipeline_mode = #tpu.pipeline_mode<synchronous>, transform_indices = @transform_3, window_bounds = array<i64: 259, 256>}, {pipeline_mode = #tpu.pipeline_mode<synchronous>, transform_indices = @transform_4, window_bounds = array<i64: 257, 128>}, {pipeline_mode = #tpu.pipeline_mode<synchronous>, transform_indices = @transform_5, window_bounds = array<i64: 131, 256>}, {pipeline_mode = #tpu.pipeline_mode<synchronous>, transform_indices = @transform_6, window_bounds = array<i64: 257, 128>}, {transform_indices = @transform_7, window_bounds = array<i64: 2, 128>}]} {
    %c0_i32 = arith.constant 0 : i32
    %0 = arith.cmpi eq, %arg0, %c0_i32 : i32
    %1 = arith.extui %0 : i1 to i32
    %c0_i32_0 = arith.constant 0 : i32
    %2 = arith.cmpi ne, %1, %c0_i32_0 : i32
    scf.if %2 {
      %c0_i32_2 = arith.constant 0 : i32
      %6 = arith.cmpi eq, %arg1, %c0_i32_2 : i32
      %7 = arith.extui %6 : i1 to i32
      %c0_i32_3 = arith.constant 0 : i32
      %8 = arith.cmpi ne, %7, %c0_i32_3 : i32
      scf.if %8 {
        %cst_12 = arith.constant 0.000000e+00 : f32
        %18 = vector.broadcast %cst_12 : f32 to vector<2x256xf32>
        %c0_13 = arith.constant 0 : index
        %c0_14 = arith.constant 0 : index
        %19 = vector.load %arg10[%c0_13, %c0_14] : memref<2x256xf32, #tpu.memory_space<vmem>>, vector<2x256xf32>
        tpu.vector_store %arg10[%c0_13, %c0_14], %18 {strides = array<i32>} : memref<2x256xf32, #tpu.memory_space<vmem>>, vector<2x256xf32>,
      } else {
      }
      %c0 = arith.constant 0 : index
      %c0_4 = arith.constant 0 : index
      %9 = vector.load %arg10[%c0, %c0_4] : memref<2x256xf32, #tpu.memory_space<vmem>>, vector<2x256xf32>
      %c0_5 = arith.constant 0 : index
      %c0_6 = arith.constant 0 : index
      %c0_7 = arith.constant 0 : index
      %10 = vector.load %arg2[%c0_5, %c0_6, %c0_7] : memref<2x64x256xbf16, #tpu.memory_space<vmem>>, vector<2x64x256xbf16>
      %11 = arith.extf %10 : vector<2x64x256xbf16> to vector<2x64x256xf32>
      %cst = arith.constant dense<0.000000e+00> : vector<2x256xf32>
      %12 = vector.multi_reduction <add>, %11, %cst [1] : vector<2x64x256xf32> to vector<2x256xf32>
      %13 = arith.addf %9, %12 : vector<2x256xf32>
      %c0_8 = arith.constant 0 : index
      %c0_9 = arith.constant 0 : index
      %14 = vector.load %arg10[%c0_8, %c0_9] : memref<2x256xf32, #tpu.memory_space<vmem>>, vector<2x256xf32>
      tpu.vector_store %arg10[%c0_8, %c0_9], %13 {strides = array<i32>} : memref<2x256xf32, #tpu.memory_space<vmem>>, vector<2x256xf32>,
      %c1_i32_10 = arith.constant 1 : i32
      %15 = arith.cmpi eq, %arg1, %c1_i32_10 : i32
      %16 = arith.extui %15 : i1 to i32
      %c0_i32_11 = arith.constant 0 : i32
      %17 = arith.cmpi ne, %16, %c0_i32_11 : i32
      scf.if %17 {
        %c0_12 = arith.constant 0 : index
        %c0_13 = arith.constant 0 : index
        %18 = vector.load %arg10[%c0_12, %c0_13] : memref<2x256xf32, #tpu.memory_space<vmem>>, vector<2x256xf32>
        %cst_14 = arith.constant 7.812500e-03 : f32
        %19 = vector.broadcast %cst_14 : f32 to vector<2x256xf32>
        %20 = arith.mulf %18, %19 : vector<2x256xf32>
        %21 = arith.truncf %20 : vector<2x256xf32> to vector<2x256xbf16>
        %c0_15 = arith.constant 0 : index
        %c0_16 = arith.constant 0 : index
        %22 = vector.load %arg5[%c0_15, %c0_16] : memref<259x256xbf16, #tpu.memory_space<vmem>>, vector<256x256xbf16>
        %c256 = arith.constant 256 : index
        %c0_17 = arith.constant 0 : index
        %23 = vector.load %arg5[%c256, %c0_17] : memref<259x256xbf16, #tpu.memory_space<vmem>>, vector<1x256xbf16>
        %24 = arith.extf %23 : vector<1x256xbf16> to vector<1x256xf32>
        %c257 = arith.constant 257 : index
        %c0_18 = arith.constant 0 : index
        %25 = vector.load %arg5[%c257, %c0_18] : memref<259x256xbf16, #tpu.memory_space<vmem>>, vector<1x256xbf16>
        %26 = arith.extf %25 : vector<1x256xbf16> to vector<1x256xf32>
        %c258 = arith.constant 258 : index
        %c0_19 = arith.constant 0 : index
        %27 = vector.load %arg5[%c258, %c0_19] : memref<259x256xbf16, #tpu.memory_space<vmem>>, vector<1x256xbf16>
        %28 = arith.extf %27 : vector<1x256xbf16> to vector<1x256xf32>
        %c0_20 = arith.constant 0 : index
        %c0_21 = arith.constant 0 : index
        %29 = vector.load %arg6[%c0_20, %c0_21] : memref<257x128xbf16, #tpu.memory_space<vmem>>, vector<256x128xbf16>
        %c256_22 = arith.constant 256 : index
        %c0_23 = arith.constant 0 : index
        %30 = vector.load %arg6[%c256_22, %c0_23] : memref<257x128xbf16, #tpu.memory_space<vmem>>, vector<1x128xbf16>
        %31 = arith.extf %30 : vector<1x128xbf16> to vector<1x128xf32>
        %cst_24 = arith.constant dense<0.000000e+00> : vector<2x256xf32>
        %32 = tpu.matmul %21, %22, %cst_24 {dimension_numbers = #tpu.dot_dimension_numbers<[1], [0], [0], [1], [0, 0, 1, 1], [], []>} : vector<2x256xbf16>, vector<256x256xbf16>, vector<2x256xf32> -> vector<2x256xf32>
        %33 = vector.broadcast %24 : vector<1x256xf32> to vector<2x256xf32>
        %34 = arith.addf %32, %33 : vector<2x256xf32>
        %cst_25 = arith.constant dense<0.000000e+00> : vector<256xf32>
        %35 = vector.multi_reduction <add>, %34, %cst_25 [0] : vector<2x256xf32> to vector<256xf32>
        %36 = vector.shape_cast %35 : vector<256xf32> to vector<1x256xf32>
        %cst_26 = arith.constant 2.000000e+00 : f32
        %37 = vector.broadcast %cst_26 : f32 to vector<1x256xf32>
        %38 = arith.divf %36, %37 : vector<1x256xf32>
        %39 = vector.broadcast %38 : vector<1x256xf32> to vector<2x256xf32>
        %40 = arith.subf %34, %39 : vector<2x256xf32>
        %41 = vector.broadcast %38 : vector<1x256xf32> to vector<2x256xf32>
        %42 = arith.subf %34, %41 : vector<2x256xf32>
        %43 = arith.mulf %40, %42 : vector<2x256xf32>
        %cst_27 = arith.constant dense<0.000000e+00> : vector<256xf32>
        %44 = vector.multi_reduction <add>, %43, %cst_27 [0] : vector<2x256xf32> to vector<256xf32>
        %45 = vector.shape_cast %44 : vector<256xf32> to vector<1x256xf32>
        %cst_28 = arith.constant 2.000000e+00 : f32
        %46 = vector.broadcast %cst_28 : f32 to vector<1x256xf32>
        %47 = arith.divf %45, %46 : vector<1x256xf32>
        %48 = vector.broadcast %38 : vector<1x256xf32> to vector<2x256xf32>
        %49 = arith.subf %34, %48 : vector<2x256xf32>
        %cst_29 = arith.constant 9.99999974E-6 : f32
        %50 = vector.broadcast %cst_29 : f32 to vector<1x256xf32>
        %51 = arith.addf %47, %50 : vector<1x256xf32>
        %52 = math.rsqrt %51 : vector<1x256xf32>
        %53 = vector.broadcast %52 : vector<1x256xf32> to vector<2x256xf32>
        %54 = arith.mulf %49, %53 : vector<2x256xf32>
        %55 = vector.broadcast %26 : vector<1x256xf32> to vector<2x256xf32>
        %56 = arith.mulf %54, %55 : vector<2x256xf32>
        %57 = vector.broadcast %28 : vector<1x256xf32> to vector<2x256xf32>
        %58 = arith.addf %56, %57 : vector<2x256xf32>
        %cst_30 = arith.constant 0.000000e+00 : f32
        %59 = vector.broadcast %cst_30 : f32 to vector<2x256xf32>
        %60 = arith.maximumf %58, %59 : vector<2x256xf32>
        %61 = arith.truncf %60 : vector<2x256xf32> to vector<2x256xbf16>
        %cst_31 = arith.constant dense<0.000000e+00> : vector<2x128xf32>
        %62 = tpu.matmul %61, %29, %cst_31 {dimension_numbers = #tpu.dot_dimension_numbers<[1], [0], [0], [1], [0, 0, 1, 1], [], []>} : vector<2x256xbf16>, vector<256x128xbf16>, vector<2x128xf32> -> vector<2x128xf32>
        %63 = vector.broadcast %31 : vector<1x128xf32> to vector<2x128xf32>
        %64 = arith.addf %62, %63 : vector<2x128xf32>
        %65 = arith.mulf %64, %64 : vector<2x128xf32>
        %cst_32 = arith.constant dense<0.000000e+00> : vector<2xf32>
        %66 = vector.multi_reduction <add>, %65, %cst_32 [1] : vector<2x128xf32> to vector<2xf32>
        %67 = vector.shape_cast %66 : vector<2xf32> to vector<2x1xf32>
        %cst_33 = arith.constant 1.000000e-24 : f32
        %68 = vector.broadcast %cst_33 : f32 to vector<2x1xf32>
        %69 = arith.maximumf %67, %68 : vector<2x1xf32>
        %70 = math.rsqrt %69 : vector<2x1xf32>
        %71 = vector.broadcast %70 : vector<2x1xf32> to vector<2x128xf32>
        %72 = arith.mulf %64, %71 : vector<2x128xf32>
        %c0_34 = arith.constant 0 : index
        %c0_35 = arith.constant 0 : index
        %73 = vector.load %arg9[%c0_34, %c0_35] : memref<2x128xf32, #tpu.memory_space<vmem>>, vector<2x128xf32>
        tpu.vector_store %arg9[%c0_34, %c0_35], %72 {strides = array<i32>} : memref<2x128xf32, #tpu.memory_space<vmem>>, vector<2x128xf32>,
      } else {
      }
    } else {
    }
    %c1_i32 = arith.constant 1 : i32
    %3 = arith.cmpi eq, %arg0, %c1_i32 : i32
    %4 = arith.extui %3 : i1 to i32
    %c0_i32_1 = arith.constant 0 : i32
    %5 = arith.cmpi ne, %4, %c0_i32_1 : i32
    scf.if %5 {
      %c1_i32_2 = arith.constant 1 : i32
      %6 = arith.cmpi eq, %arg1, %c1_i32_2 : i32
      %7 = arith.extui %6 : i1 to i32
      %c0_i32_3 = arith.constant 0 : i32
      %8 = arith.cmpi ne, %7, %c0_i32_3 : i32
      scf.if %8 {
        %c0 = arith.constant 0 : index
        %c0_4 = arith.constant 0 : index
        %9 = vector.load %arg4[%c0, %c0_4] : memref<2x8xf32, #tpu.memory_space<vmem>>, vector<2x8xf32>
        %10 = math.absf %9 : vector<2x8xf32>
        %cst = arith.constant dense<0.000000e+00> : vector<2xf32>
        %11 = vector.multi_reduction <add>, %10, %cst [1] : vector<2x8xf32> to vector<2xf32>
        %12 = vector.shape_cast %11 : vector<2xf32> to vector<2x1xf32>
        %cst_5 = arith.constant 9.99999996E-13 : f32
        %13 = vector.broadcast %cst_5 : f32 to vector<2x1xf32>
        %14 = arith.maximumf %12, %13 : vector<2x1xf32>
        %15 = vector.broadcast %14 : vector<2x1xf32> to vector<2x8xf32>
        %16 = arith.divf %9, %15 : vector<2x8xf32>
        %c0_6 = arith.constant 0 : index
        %c0_7 = arith.constant 0 : index
        %17 = vector.load %arg3[%c0_6, %c0_7] : memref<16x128xbf16, #tpu.memory_space<vmem>>, vector<16x128xbf16>
        %c0_8 = arith.constant 0 : index
        %c0_9 = arith.constant 0 : index
        %18 = vector.load %arg7[%c0_8, %c0_9] : memref<131x256xbf16, #tpu.memory_space<vmem>>, vector<128x256xbf16>
        %c128 = arith.constant 128 : index
        %c0_10 = arith.constant 0 : index
        %19 = vector.load %arg7[%c128, %c0_10] : memref<131x256xbf16, #tpu.memory_space<vmem>>, vector<1x256xbf16>
        %20 = arith.extf %19 : vector<1x256xbf16> to vector<1x256xf32>
        %c129 = arith.constant 129 : index
        %c0_11 = arith.constant 0 : index
        %21 = vector.load %arg7[%c129, %c0_11] : memref<131x256xbf16, #tpu.memory_space<vmem>>, vector<1x256xbf16>
        %22 = arith.extf %21 : vector<1x256xbf16> to vector<1x256xf32>
        %c130 = arith.constant 130 : index
        %c0_12 = arith.constant 0 : index
        %23 = vector.load %arg7[%c130, %c0_12] : memref<131x256xbf16, #tpu.memory_space<vmem>>, vector<1x256xbf16>
        %24 = arith.extf %23 : vector<1x256xbf16> to vector<1x256xf32>
        %c0_13 = arith.constant 0 : index
        %c0_14 = arith.constant 0 : index
        %25 = vector.load %arg8[%c0_13, %c0_14] : memref<257x128xbf16, #tpu.memory_space<vmem>>, vector<256x128xbf16>
        %c256 = arith.constant 256 : index
        %c0_15 = arith.constant 0 : index
        %26 = vector.load %arg8[%c256, %c0_15] : memref<257x128xbf16, #tpu.memory_space<vmem>>, vector<1x128xbf16>
        %27 = arith.extf %26 : vector<1x128xbf16> to vector<1x128xf32>
        %cst_16 = arith.constant dense<0.000000e+00> : vector<16x256xf32>
        %28 = tpu.matmul %17, %18, %cst_16 {dimension_numbers = #tpu.dot_dimension_numbers<[1], [0], [0], [1], [0, 0, 1, 1], [], []>} : vector<16x128xbf16>, vector<128x256xbf16>, vector<16x256xf32> -> vector<16x256xf32>
        %29 = vector.broadcast %20 : vector<1x256xf32> to vector<16x256xf32>
        %30 = arith.addf %28, %29 : vector<16x256xf32>
        %cst_17 = arith.constant dense<0.000000e+00> : vector<256xf32>
        %31 = vector.multi_reduction <add>, %30, %cst_17 [0] : vector<16x256xf32> to vector<256xf32>
        %32 = vector.shape_cast %31 : vector<256xf32> to vector<1x256xf32>
        %cst_18 = arith.constant 1.600000e+01 : f32
        %33 = vector.broadcast %cst_18 : f32 to vector<1x256xf32>
        %34 = arith.divf %32, %33 : vector<1x256xf32>
        %35 = vector.broadcast %34 : vector<1x256xf32> to vector<16x256xf32>
        %36 = arith.subf %30, %35 : vector<16x256xf32>
        %37 = vector.broadcast %34 : vector<1x256xf32> to vector<16x256xf32>
        %38 = arith.subf %30, %37 : vector<16x256xf32>
        %39 = arith.mulf %36, %38 : vector<16x256xf32>
        %cst_19 = arith.constant dense<0.000000e+00> : vector<256xf32>
        %40 = vector.multi_reduction <add>, %39, %cst_19 [0] : vector<16x256xf32> to vector<256xf32>
        %41 = vector.shape_cast %40 : vector<256xf32> to vector<1x256xf32>
        %cst_20 = arith.constant 1.600000e+01 : f32
        %42 = vector.broadcast %cst_20 : f32 to vector<1x256xf32>
        %43 = arith.divf %41, %42 : vector<1x256xf32>
        %44 = vector.broadcast %34 : vector<1x256xf32> to vector<16x256xf32>
        %45 = arith.subf %30, %44 : vector<16x256xf32>
        %cst_21 = arith.constant 9.99999974E-6 : f32
        %46 = vector.broadcast %cst_21 : f32 to vector<1x256xf32>
        %47 = arith.addf %43, %46 : vector<1x256xf32>
        %48 = math.rsqrt %47 : vector<1x256xf32>
        %49 = vector.broadcast %48 : vector<1x256xf32> to vector<16x256xf32>
        %50 = arith.mulf %45, %49 : vector<16x256xf32>
        %51 = vector.broadcast %22 : vector<1x256xf32> to vector<16x256xf32>
        %52 = arith.mulf %50, %51 : vector<16x256xf32>
        %53 = vector.broadcast %24 : vector<1x256xf32> to vector<16x256xf32>
        %54 = arith.addf %52, %53 : vector<16x256xf32>
        %cst_22 = arith.constant 0.000000e+00 : f32
        %55 = vector.broadcast %cst_22 : f32 to vector<16x256xf32>
        %56 = arith.maximumf %54, %55 : vector<16x256xf32>
        %57 = arith.truncf %56 : vector<16x256xf32> to vector<16x256xbf16>
        %cst_23 = arith.constant dense<0.000000e+00> : vector<16x128xf32>
        %58 = tpu.matmul %57, %25, %cst_23 {dimension_numbers = #tpu.dot_dimension_numbers<[1], [0], [0], [1], [0, 0, 1, 1], [], []>} : vector<16x256xbf16>, vector<256x128xbf16>, vector<16x128xf32> -> vector<16x128xf32>
        %59 = vector.broadcast %27 : vector<1x128xf32> to vector<16x128xf32>
        %60 = arith.addf %58, %59 : vector<16x128xf32>
        %61 = vector.shape_cast %60 : vector<16x128xf32> to vector<2x8x128xf32>
        %62 = vector.shape_cast %16 : vector<2x8xf32> to vector<2x1x8xf32>
        %cst_24 = arith.constant dense<0.000000e+00> : vector<2x1x128xf32>
        %63 = tpu.matmul %62, %61, %cst_24 {dimension_numbers = #tpu.dot_dimension_numbers<[2], [1], [1], [2], [0, 0, 0, 1, 1, 2], [0], [0]>} : vector<2x1x8xf32>, vector<2x8x128xf32>, vector<2x1x128xf32> -> vector<2x1x128xf32>
        %64 = vector.shape_cast %63 : vector<2x1x128xf32> to vector<2x128xf32>
        %65 = arith.mulf %64, %64 : vector<2x128xf32>
        %cst_25 = arith.constant dense<0.000000e+00> : vector<2xf32>
        %66 = vector.multi_reduction <add>, %65, %cst_25 [1] : vector<2x128xf32> to vector<2xf32>
        %67 = vector.shape_cast %66 : vector<2xf32> to vector<2x1xf32>
        %cst_26 = arith.constant 1.000000e-24 : f32
        %68 = vector.broadcast %cst_26 : f32 to vector<2x1xf32>
        %69 = arith.maximumf %67, %68 : vector<2x1xf32>
        %70 = math.rsqrt %69 : vector<2x1xf32>
        %71 = vector.broadcast %70 : vector<2x1xf32> to vector<2x128xf32>
        %72 = arith.mulf %64, %71 : vector<2x128xf32>
        %c0_27 = arith.constant 0 : index
        %c0_28 = arith.constant 0 : index
        %73 = vector.load %arg9[%c0_27, %c0_28] : memref<2x128xf32, #tpu.memory_space<vmem>>, vector<2x128xf32>
        tpu.vector_store %arg9[%c0_27, %c0_28], %72 {strides = array<i32>} : memref<2x128xf32, #tpu.memory_space<vmem>>, vector<2x128xf32>,
      } else {
      }
    } else {
    }
    return
  }
  func.func @transform_0(%arg0: i32, %arg1: i32) -> (i32, i32, i32) {
    %c1_i32 = arith.constant 1 : i32
    %0 = arith.subi %c1_i32, %arg0 : i32
    %1 = arith.muli %arg1, %0 : i32
    %c1_i32_0 = arith.constant 1 : i32
    %2 = arith.muli %c1_i32_0, %arg0 : i32
    %3 = arith.addi %1, %2 : i32
    %c0_i32 = arith.constant 0 : i32
    %c0_i32_1 = arith.constant 0 : i32
    %c0_i32_2 = arith.constant 0 : i32
    return %c0_i32, %3, %c0_i32_1 : i32, i32, i32
  }
  func.func @transform_1(%arg0: i32, %arg1: i32) -> (i32, i32) {
    %c0_i32 = arith.constant 0 : i32
    %c0_i32_0 = arith.constant 0 : i32
    %c0_i32_1 = arith.constant 0 : i32
    return %c0_i32, %c0_i32_0 : i32, i32
  }
  func.func @transform_2(%arg0: i32, %arg1: i32) -> (i32, i32) {
    %c0_i32 = arith.constant 0 : i32
    %c0_i32_0 = arith.constant 0 : i32
    %c0_i32_1 = arith.constant 0 : i32
    return %c0_i32, %c0_i32_0 : i32, i32
  }
  func.func @transform_3(%arg0: i32, %arg1: i32) -> (i32, i32) {
    %c0_i32 = arith.constant 0 : i32
    %c0_i32_0 = arith.constant 0 : i32
    %c0_i32_1 = arith.constant 0 : i32
    return %c0_i32, %c0_i32_0 : i32, i32
  }
  func.func @transform_4(%arg0: i32, %arg1: i32) -> (i32, i32) {
    %c0_i32 = arith.constant 0 : i32
    %c0_i32_0 = arith.constant 0 : i32
    %c0_i32_1 = arith.constant 0 : i32
    return %c0_i32, %c0_i32_0 : i32, i32
  }
  func.func @transform_5(%arg0: i32, %arg1: i32) -> (i32, i32) {
    %c0_i32 = arith.constant 0 : i32
    %c0_i32_0 = arith.constant 0 : i32
    %c0_i32_1 = arith.constant 0 : i32
    return %c0_i32, %c0_i32_0 : i32, i32
  }
  func.func @transform_6(%arg0: i32, %arg1: i32) -> (i32, i32) {
    %c0_i32 = arith.constant 0 : i32
    %c0_i32_0 = arith.constant 0 : i32
    %c0_i32_1 = arith.constant 0 : i32
    return %c0_i32, %c0_i32_0 : i32, i32
  }
  func.func @transform_7(%arg0: i32, %arg1: i32) -> (i32, i32) {
    %c0_i32 = arith.constant 0 : i32
    %c0_i32_0 = arith.constant 0 : i32
    return %c0_i32, %arg0 : i32, i32
  }
}

</mosaic_0001>

<bundles_post_ra>
// kernel: tpu_custom_call.1
= control target key start
LH: loop header
LB: loop body
LE: loop exit
PB: predicated region body
PF: predicated region fallthrough
CT: control target
= control target key end

     0   :  { %s3087_s0 = inlined_call_operand.hbm [shape: bf16[2,128,256], index: 0, kind: input, shape index: {}]   ;;  %s3088_s1 = inlined_call_operand.hbm [shape: bf16[16,128], index: 1, kind: input, shape index: {}]   ;;  %s3089_s2 = inlined_call_operand.vmem [shape: f32[2,8], index: 2, kind: input, shape index: {}]   ;;  %s3090_s3 = inlined_call_operand.hbm [shape: bf16[259,256], index: 3, kind: input, shape index: {}]   ;;  %s3091_s4 = inlined_call_operand.hbm [shape: bf16[257,128], index: 4, kind: input, shape index: {}]   ;;  %s3092_s5 = inlined_call_operand.hbm [shape: bf16[131,256], index: 5, kind: input, shape index: {}]   ;;  %s3093_s6 = inlined_call_operand.hbm [shape: bf16[257,128], index: 6, kind: input, shape index: {}]   ;;  %s3094_s7 = inlined_call_operand.hbm [shape: f32[2,256], index: 7, kind: output, shape index: {}]  }
   0x1   :  { %3113 = sst [smem:[#allocation35_spill]] %s3089_s2 }
   0x2   :  { %3114 = sst [smem:[#allocation36_spill]] %s3094_s7 }
   0x3   :  { %12 = vsyncpa [#allocation4], 0 }
   0x4   :  { %14 = vsyncpa [#allocation4 + $0x1], 0 }
   0x5   :  { %15 = vsyncpa [#allocation7], 0 }
   0x6   :  { %16 = vsyncpa [#allocation10], 0 }
   0x7   :  { %17 = vsyncpa [#allocation13], 0 }
   0x8   :  { %18 = vsyncpa [#allocation5], 0 }
   0x9   :  { %20 = vsyncpa [#allocation5 + $0x1], 0  ;;  %s2655_s24 = smov 0   ;;  %s2657_s25 = smov 0  }
   0xa   :  { %s2659_s26 = smov 0   ;;  %s2661_s27 = smov 0  }
   0xb   :  { %s2663_s28 = smov 0   ;;  %s2665_s29 = smov 0  }
   0xc   :  { %s2667_s30 = smov 0   ;;  %s2669_s8 = smov 0  }
   0xd   :  { %s2671_s9 = smov 0   ;;  %s2673_s10 = smov 0  }
   0xe   :  { %s2675_s11 = smov 0  }
   0xf LB: > { %3115 = sst [smem:[#allocation23_spill]] %s2552_s24  ;;  %s1854_s12 = sadd.s32 4294967295, %s2592_s11   ;;  %s2592_s11 = sphi %s2675_s11, %s26_s11   ;;  %s2588_s10 = sphi %s2673_s10, %s3168_s10   ;;  %s2584_s9 = sphi %s2671_s9, %s3161_s9   ;;  %s2580_s8 = sphi %s2669_s8, %s3160_s8   ;;  %s2576_s30 = sphi %s2667_s30, %s3159_s30   ;;  %s2572_s29 = sphi %s2665_s29, %s3167_s29   ;;  %s2568_s28 = sphi %s2663_s28, %s3166_s28   ;;  %s2564_s27 = sphi %s2661_s27, %s3165_s27   ;;  %s2560_s26 = sphi %s2659_s26, %s3157_s26   ;;  %s2556_s25 = sphi %s2657_s25, %s3164_s25   ;;  %s2552_s24 = sphi %s2655_s24, %s3163_s24  }
  0x10   : > { %3116 = sst [smem:[#allocation24_spill]] %s2560_s26  ;;  %s35_s14 = sadd.s32 1, %s2584_s9 }
  0x11   : > { %3117 = sst [smem:[#allocation25_spill]] %s2576_s30  ;;  %s38_s15 = sadd.s32 1, %s2588_s10 }
  0x12   : > { %3118 = sst [smem:[#allocation26_spill]] %s2580_s8  ;;  %p36_p0 = scmp.ge.s32.totalorder %s35_s14, 2 }
  0x13   : > { %3119 = sst [smem:[#allocation27_spill]] %s2584_s9  ;;  %s42_s16 = ssub.s32 1, %s2588_s10 }
  0x14   : > { %3120 = sst [smem:[#allocation28_spill]] %s2588_s10  ;;  %s43_s17 = smul.u32 %s2584_s9, %s42_s16 }
  0x15   : > { %s51_s18 = sadd.s32 1, %s2572_s29  ;;  %s3170_s14 = smov (%p36_p0, %s35_s14), 0 }
  0x16   : > { %3121 = sst [smem:[#allocation29_spill]] %s3170_s14  ;;  %s3172_s15 = smov (!%p36_p0, %s38_s15), %s2588_s10 }
  0x17   : > { %s2719_s19 = sadd.s32 %s2588_s10, %s43_s17  ;;  %p58_p1 = scmp.ne.s32.totalorder %s2572_s29, %s2568_s28 }
  0x18   : > { %p40_p2 = scmp.ge.s32.totalorder %s3172_s15, 2  ;;  %p59_p3 = scmp.eq.s32.totalorder %s2592_s11, 0 }
  0x19   : > { %p64_p4 = scmp.ne.s32.totalorder %s2568_s28, %s2564_s27  ;;  %p2725_p5 = scmp.eq.s32.totalorder %s1854_s12, 0 }
  0x1a   : > { %s3174_s15 = smov (%p40_p2, %s3172_s15), 0  ;;  %p2731_p6 = por %p59_p3, %p58_p1 }
  0x1b   : > { %s3122_s20 = scalar_select %p2725_p5, 1, 0 }
  0x1c   : > { %3123 = sst [smem:[#allocation30_spill]] %s3174_s15  ;;  %p2737_p7 = por %p2725_p5, %p64_p4 }
  0x1d   : > { %s3124_s21 = scalar_select %p2731_p6, 1, 0 }
  0x1e   : > { %s3125_s22 = scalar_select %p2737_p7, 1, 0 }
  0x1f   : > { %s45_s23 = ssub.s32 1, %s3174_s15  ;;  %s200_s27 = ssub.s32 %s2588_s10, %s3174_s15 }
  0x20   : > { %s46_s16 = smul.u32 %s45_s23, %s3170_s14  ;;  %p201_p8 = scmp.eq.s32.totalorder %s200_s27, 0 }
  0x21   : > { %s203_s17 = sadd.s32 1, %s2560_s26  ;;  %p213_p9 = scmp.ne.s32.totalorder %s2560_s26, %s2556_s25 }
  0x22   : > { %s47_s13 = sadd.s32 %s46_s16, %s3174_s15  ;;  %p214_p10 = scmp.eq.s32.totalorder %s1854_s12, 3 }
  0x23   : > { %s48_s9 = ssub.s32 %s2719_s19, %s47_s13  ;;  %p219_p11 = scmp.ne.s32.totalorder %s2556_s25, %s2552_s24 }
  0x24   : > { %p49_p12 = scmp.eq.s32.totalorder %s48_s9, 0  ;;  %p2752_p13 = por %p214_p10, %p213_p9 }
  0x25   : > { %s2757_s2 = scalar_select %p201_p8, %s2560_s26, %s203_s17  }
  0x26   : > { %s3126_s7 = scalar_select %p2752_p13, 1, 0 }
  0x27   : > { %3128 = sst [smem:[#allocation32_spill]] %s2757_s2  ;;  %s3130_s8 = sadd.s32 4294967294, %s2592_s11  }
  0x28   : > { %3127 = sst [smem:[#allocation31_spill]] %s3126_s7  ;;  %p220_p0 = scmp.eq.s32.totalorder %s3130_s8, 3 }
  0x29   : > { %s2760_s30 = scalar_select %p49_p12, %s2572_s29, %s51_s18  }
  0x2a   : > { %p1856_p1 = scmp.ge.s32.totalorder %s2592_s11, 1  ;;  %p227_p2 = scmp.lt.s32.totalorder %s2592_s11, 5 }
  0x2b   : > { %3129 = sst [smem:[#allocation33_spill]] %s2760_s30  ;;  %p2766_p3 = por %p220_p0, %p219_p11 }
  0x2c   : > { %p2770_p4 = pnand %p1856_p1, %p227_p2  ;;  %s2594_s9 = smov [#allocation6]  }
  0x2d   : > { %s3131_s23 = scalar_select %p2766_p3, 1, 0 }
  0x2e   : > { %s3133_s12 = scalar_select %p2770_p4, 1, 0 }
  0x2f   : > { %3132 = sst [smem:[#allocation34_spill]] %s3131_s23  ;;  %s239_s13 = sshll.u32 %s2594_s9, 4  ;;  %s2774_s13 = int_to_ptr.vmem [resolvable:$true] %s239_s13 }
  0x30   : > { %p2060_p8 = pneg %p2770_p4  ;;  %s2595_s18 = smov [#allocation9]  }
  0x31   : > { %s268_s27 = sshll.u32 %s2595_s18, 4  ;;  %s2596_s16 = smov [#allocation8]   ;;  %s2784_s27 = int_to_ptr.vmem [resolvable:$true] %s268_s27 }
  0x32   : > { %p2780_p9 = pnand %p2060_p8, %p2725_p5  ;;  %s255_s17 = sshll.u32 %s2596_s16, 4  ;;  %s2786_s17 = int_to_ptr.vmem [resolvable:$true] %s255_s17 }
  0x33   : > { %s2318_s14 = scalar_lea.hbm %s3088_s1, 128 }
  0x34   : > { %p2319_p10 = scmp.ne.s32.totalorder %s3088_s1, %s2318_s14  ;;  %p2796_p11 = pneg %p2780_p9 }
  0x35   : > { %p2325_p1 = scmp.lt.u32.totalorder %s2318_s14, %s3088_s1 }
  0x36   : > { %p2321_p12 = pnand %p2796_p11, %p2319_p10 }
  0x38   : > { %p2322_p0 = pneg %p2321_p12 }
  0x3a   : > { %p2327_p2 = pnand %p2325_p1, %p2322_p0 }
  0x3c   : > { %2330 = shalt.err (!%p2327_p2)
}
  0x3d   : > { %s2331_s30 = scalar_lea.vmem %s2774_s13, 128  ;;  %p2339_p5 = scmp.lt.s32.totalorder %s2774_s13, %s2774_s13 }
  0x3e   : > { %p2332_p8 = scmp.ne.s32.totalorder %s2774_s13, %s2331_s30  ;;  %p2340_p7 = scmp.lt.s32.totalorder %s2331_s30, %s2331_s30 }
  0x40   : > { %p2334_p3 = pnand %p2332_p8, %p2796_p11  ;;  %p2341_p10 = por %p2340_p7, %p2339_p5 }
  0x42   : > { %p2335_p13 = pneg %p2334_p3 }
  0x44   : > { %p2342_p12 = pnand %p2341_p10, %p2335_p13 }
  0x46   : > { %2345 = shalt.err (!%p2342_p12)
}
  0x47   : > { %s3109_s10 = smov 64   ;;  %s3110_s14 = smov 4  }
  0x48   : > { %2063 = dma.hbm_to_vmem [thread:$0]  (!%p2780_p9), %s3088_s1, 128, %s2774_s13, [#allocation7], %s3109_s10, %s3109_s10, %s3110_s14  }
  0x49   : > { %s2346_s30 = scalar_lea.hbm %s3091_s4, 2112 }
  0x4a   : > { %p2347_p5 = scmp.ne.s32.totalorder %s3091_s4, %s2346_s30  ;;  %p2353_p3 = scmp.lt.u32.totalorder %s2346_s30, %s3091_s4 }
  0x4c   : > { %p2349_p7 = pnand %p2347_p5, %p2796_p11 }
  0x4e   : > { %p2350_p13 = pneg %p2349_p7 }
  0x50   : > { %p2355_p0 = pnand %p2353_p3, %p2350_p13 }
  0x52   : > { %2358 = shalt.err (!%p2355_p0)
}
  0x53   : > { %s2359_s13 = scalar_lea.vmem %s2784_s27, 2112  ;;  %p2367_p10 = scmp.lt.s32.totalorder %s2784_s27, %s2784_s27 }
  0x54   : > { %p2360_p1 = scmp.ne.s32.totalorder %s2784_s27, %s2359_s13  ;;  %p2368_p12 = scmp.lt.s32.totalorder %s2359_s13, %s2359_s13 }
  0x56   : > { %p2362_p2 = pnand %p2360_p1, %p2796_p11  ;;  %p2369_p5 = por %p2368_p12, %p2367_p10 }
  0x58   : > { %p2363_p8 = pneg %p2362_p2 }
  0x5a   : > { %p2370_p7 = pnand %p2369_p5, %p2363_p8 }
  0x5c   : > { %2373 = shalt.err (!%p2370_p7)
}
  0x5d   : > { %2069 = dma.hbm_to_vmem [thread:$0]  (!%p2780_p9), %s3091_s4, 2112, %s2784_s27, [#allocation10], %s3109_s10, %s3109_s10, %s3110_s14  }
  0x5e   : > { %s2374_s15 = scalar_lea.hbm %s3090_s3, 4224 }
  0x5f   : > { %p2375_p13 = scmp.ne.s32.totalorder %s3090_s3, %s2374_s15  ;;  %p2381_p1 = scmp.lt.u32.totalorder %s2374_s15, %s3090_s3 }
  0x61   : > { %p2377_p3 = pnand %p2375_p13, %p2796_p11 }
  0x63   : > { %p2378_p0 = pneg %p2377_p3 }
  0x65   : > { %p2383_p2 = pnand %p2381_p1, %p2378_p0 }
  0x67   : > { %2386 = shalt.err (!%p2383_p2)
}
  0x68   : > { %s2387_s27 = scalar_lea.vmem %s2786_s17, 4224  ;;  %p2395_p5 = scmp.lt.s32.totalorder %s2786_s17, %s2786_s17 }
  0x69   : > { %p2388_p8 = scmp.ne.s32.totalorder %s2786_s17, %s2387_s27  ;;  %p2396_p7 = scmp.lt.s32.totalorder %s2387_s27, %s2387_s27 }
  0x6b   : > { %p2390_p10 = pnand %p2388_p8, %p2796_p11  ;;  %p2397_p13 = por %p2396_p7, %p2395_p5 }
  0x6d   : > { %p2391_p12 = pneg %p2390_p10 }
  0x6f   : > { %p2398_p3 = pnand %p2397_p13, %p2391_p12 }
  0x71   : > { %2401 = shalt.err (!%p2398_p3)
}
  0x72   : > { %s2599_s13 = smov 128   ;;  %s2600_s7 = smov 8  }
  0x73   : > { %2066 = dma.hbm_to_vmem [thread:$0]  (!%p2780_p9), %s3090_s3, 4224, %s2786_s17, [#allocation7], %s2599_s13, %s2599_s13, %s2600_s7  }
  0x74   : > { %s2601_s23 = smov [#allocation11]   ;;  %s2602_s9 = smov [#allocation12]  }
  0x75   : > { %s281_s15 = sshll.u32 %s2601_s23, 4  ;;  %s294_s18 = sshll.u32 %s2602_s9, 4  ;;  %s282_s15 = int_to_ptr.vmem [resolvable:$true] %s281_s15  ;;  %s2869_s18 = int_to_ptr.vmem [resolvable:$true] %s294_s18 }
  0x76   : > { %s2402_s27 = scalar_lea.hbm %s3092_s5, 2176 }
  0x77   : > { %p2403_p0 = scmp.ne.s32.totalorder %s3092_s5, %s2402_s27  ;;  %p2409_p8 = scmp.lt.u32.totalorder %s2402_s27, %s3092_s5 }
  0x79   : > { %p2405_p1 = pnand %p2403_p0, %p2796_p11 }
  0x7b   : > { %p2406_p2 = pneg %p2405_p1 }
  0x7d   : > { %p2411_p10 = pnand %p2409_p8, %p2406_p2 }
  0x7f   : > { %2414 = shalt.err (!%p2411_p10)
}
  0x80   : > { %s2415_s26 = scalar_lea.vmem %s282_s15, 2176  ;;  %p2423_p13 = scmp.lt.s32.totalorder %s282_s15, %s282_s15 }
  0x81   : > { %p2416_p12 = scmp.ne.s32.totalorder %s282_s15, %s2415_s26  ;;  %p2424_p3 = scmp.lt.s32.totalorder %s2415_s26, %s2415_s26 }
  0x83   : > { %p2418_p5 = pnand %p2416_p12, %p2796_p11  ;;  %p2425_p4 = por %p2424_p3, %p2423_p13 }
  0x85   : > { %p2419_p7 = pneg %p2418_p5 }
  0x87   : > { %p2426_p6 = pnand %p2425_p4, %p2419_p7 }
  0x89   : > { %2429 = shalt.err (!%p2426_p6)
}
  0x8a   : > { %2072 = dma.hbm_to_vmem [thread:$0]  (!%p2780_p9), %s3092_s5, 2176, %s282_s15, [#allocation10], %s2599_s13, %s2599_s13, %s2600_s7  }
  0x8b   : > { %s2430_s16 = scalar_lea.hbm %s3093_s6, 2112 }
  0x8c   : > { %p2431_p0 = scmp.ne.s32.totalorder %s3093_s6, %s2430_s16  ;;  %p2437_p6 = scmp.lt.u32.totalorder %s2430_s16, %s3093_s6 }
  0x8e   : > { %p2433_p1 = pnand %p2431_p0, %p2796_p11 }
  0x90   : > { %p2434_p2 = pneg %p2433_p1 }
  0x92   : > { %p2439_p4 = pnand %p2437_p6, %p2434_p2 }
  0x94   : > { %2442 = shalt.err (!%p2439_p4)
}
  0x95   : > { %s2443_s13 = scalar_lea.vmem %s2869_s18, 2112  ;;  %p2451_p5 = scmp.lt.s32.totalorder %s2869_s18, %s2869_s18 }
  0x96   : > { %p2444_p8 = scmp.ne.s32.totalorder %s2869_s18, %s2443_s13  ;;  %p2452_p7 = scmp.lt.s32.totalorder %s2443_s13, %s2443_s13 }
  0x98   : > { %p2446_p10 = pnand %p2444_p8, %p2796_p11  ;;  %p2453_p13 = por %p2452_p7, %p2451_p5 }
  0x9a   : > { %p2447_p12 = pneg %p2446_p10 }
  0x9c   : > { %p2454_p3 = pnand %p2453_p13, %p2447_p12 }
  0x9e   : > { %2457 = shalt.err (!%p2454_p3)
}
  0x9f   : > { %s3136_s7 = smov 4   ;;  %s3137_s15 = smov 64  }
  0xa0   : > { %2075 = dma.hbm_to_vmem [thread:$0]  (!%p2780_p9), %s3093_s6, 2112, %s2869_s18, [#allocation13], %s3137_s15, %s3137_s15, %s3136_s7  }
  0xa1   : > { %p1862_p0 = scmp.ge.s32.totalorder %s2592_s11, 4 }
  0xa3   : > { %304 = sbr.rel (%p1862_p0) target bundleno = 184 (0xb8), region = 40 }
  0xaa   : > { %s308_s2 = sand.u32 1, %s2572_s29   ;;  %s1970_s14 = sshll.u32 %s2719_s19, 10 }
  0xab   : > { %s1863_s8 = sshll.u32 %s308_s2, 7  ;;  %p3138_p11 = scmp.ne.s32.totalorder %s3124_s21, 0 }
  0xac   : > { %s322_s18 = scalar_lea.hbm %s3087_s0, %s1970_s14  ;;  %s312_s27 = scalar_lea.vmem [#allocation3], %s1863_s8 }
  0xad   : > { %s2039_s23 = scalar_select %p3138_p11, [#allocation0], [#allocation17] }
  0xae   : > { %s335_s24 = sshll.u32 %s312_s27, 4  ;;  %s2603_s17 = smov 2048   ;;  %s336_s24 = int_to_ptr.vmem [resolvable:$true] %s335_s24 }
  0xaf   : > { %s327_s30 = sld [smem:[%s2039_s23]]   ;;  %s2604_s13 = smov 1024  }
  0xb0   : > { %2040 = sst [smem:[#allocation16]] (%p3138_p11), %s2603_s17  ;;  %s2605_s7 = smov 8  }
  0xb1   : > { %2041 = sst [smem:[#allocation16 + $0x1]] (%p3138_p11), %s2604_s13  ;;  %s2606_s19 = smov 128  }
  0xb2   : > { %2042 = sst [smem:[#allocation16 + $0x2]] (%p3138_p11), %s2605_s7  ;;  %s309_s10 = scalar_lea.sflag [#allocation4], %s308_s2 }
  0xb3   : > { %2043 = sst [smem:[#allocation16 + $0x3]] (%p3138_p11), %s2606_s19  ;;  %s2607_s8 = smov [#allocation15]  }
  0xb4   : > { %2044 = sst [smem:[#allocation16 + $0x4]] (%p3138_p11), %s2606_s19 }
  0xb5   : > { %s1867_s15 = sshll.u32 %s327_s30, 26  ;;  %2045 = sst [smem:[#allocation16 + $0x5]] (%p3138_p11), %s2605_s7 }
  0xb6   : > { %s1868_s26 = sadd.s32 134217728, %s1867_s15 }
  0xb7   : > { %2046 = dma.general (%p3138_p11), %s322_s18, 2048, %s336_s24, %s309_s10, %s2607_s8, [#allocation16], %s1868_s26, 0  }
  0xb8 PF: > { %p3139_p9 = scmp.ne.s32.totalorder %s3133_s12, 0 }
  0xb9   : > { %s362_s14 = sand.u32 (!%p3139_p9), 1, %s2568_s28   ;;  %p3140_p1 = scmp.ne.s32.totalorder (!%p3139_p9), %s3125_s22, 0 }
  0xba   : > { %360 = sbr.rel (%p3139_p9) target bundleno = 1907 (0x773), region = 48  ;;  %s1870_s23 = sshll.u32 (!%p3139_p9), %s362_s14, 7 }
  0xbb   : > { %s363_s9 = scalar_lea.sflag (!%p3139_p9), [#allocation4], %s362_s14  ;;  %s2940_s16 = scalar_lea.vmem (!%p3139_p9), [#allocation3], %s1870_s23 }
  0xc1   : > { %2531 = dma.done.wait (%p3140_p1), %s363_s9, 2048  }
  0xc2   : > { %2533 = vsyncadd (%p3140_p1), %s363_s9, 4294965248  ;;  %p3141_p2 = scmp.ne.s32.totalorder %s3122_s20, 0 }
  0xc4   : > { %2535 = dma.done.wait (%p3141_p2), [#allocation7], 4352  }
  0xc5   : > { %2537 = vsyncadd (%p3141_p2), [#allocation7], 4294962944 }
  0xc6   : > { %2539 = dma.done.wait (%p3141_p2), [#allocation10], 4288  }
  0xc7   : > { %2541 = vsyncadd (%p3141_p2), [#allocation10], 4294963008 }
  0xc8   : > { %2543 = dma.done.wait (%p3141_p2), [#allocation13], 2112  }
  0xc9   : > { %2545 = vsyncadd (%p3141_p2), [#allocation13], 4294965184  ;;  %s414_s21 = sand.u32 1, %s2556_s25   ;;  %s3142_s2 = sld [smem:[#allocation26_spill]] }
  0xca   : > { %s1876_s22 = sshll.u32 %s414_s21, 1 }
  0xcb   : > { %s2961_s12 = scalar_lea.vmem [#allocation14], %s1876_s22 }
  0xcf   : > { %p1877_p6 = scmp.ne.s32.totalorder %s3142_s2, 0 }
  0xd0   : > { %s3143_s18 = sld [smem:[#allocation25_spill]] (!%p1877_p6) }
  0xd1   : > { %425 = sbr.rel (%p1877_p6) target bundleno = 954 (0x3ba), region = 76 }
  0xd6   : > { %p1878_p4 = scmp.ne.s32.totalorder (!%p1877_p6), %s3143_s18, 0 }
  0xd8   : > { %429 = sbr.rel (%p1878_p4) target bundleno = 223 (0xdf), region = 80  ;;  %v2608_v0 = vmov (!%p1878_p4), 0.0  }
  0xd9   : > { %430 = vst [vmem:[#allocation2] sm:$0xf] (!%p1878_p4), %v2608_v0 }
  0xdf PF: > { %v432_v1 = vld [vmem:[%s2940_s16] sm:$0xff]  ;;  %v433_v2 = vld [vmem:[%s2940_s16 + $0x8] sm:$0xff]  ;;  %v434_v5 = vld [vmem:[%s2940_s16 + $0x10] sm:$0xff]  ;;  %vm557_vm0 = vcmask 1041409   ;;  %vm559_vm1 = vcmask 1043459   ;;  %vm561_vm2 = vcmask 1045509  }
  0xe0   : > { %v440_v3 = vld [vmem:[%s2940_s16 + $0x40] sm:$0xff]  ;;  %v441_v4 = vld [vmem:[%s2940_s16 + $0x48] sm:$0xff]  ;;  %v442_v6 = vld [vmem:[%s2940_s16 + $0x50] sm:$0xff]  ;;  %v448_v7 = vunpack.c.l.bf16 %v432_v1  ;;  %v449_v8 = vunpack.c.h.bf16 %v432_v1  ;;  %v450_v9 = vunpack.c.l.bf16 %v433_v2  ;;  %v451_v10 = vunpack.c.h.bf16 %v433_v2  ;;  %s3144_s20 = sld [smem:[#allocation25_spill]] }
  0xe1   : > { %v435_v11 = vld [vmem:[%s2940_s16 + $0x18] sm:$0xff]  ;;  %v464_v13 = vunpack.c.l.bf16 %v440_v3  ;;  %v465_v14 = vunpack.c.h.bf16 %v440_v3  ;;  %v466_v15 = vunpack.c.l.bf16 %v441_v4  ;;  %v467_v16 = vunpack.c.h.bf16 %v441_v4  ;;  %v436_v17 = vld [vmem:[%s2940_s16 + $0x20] sm:$0xff]  ;;  %v437_v27 = vld [vmem:[%s2940_s16 + $0x28] sm:$0xff] }
  0xe2   : > { %v443_v12 = vld [vmem:[%s2940_s16 + $0x58] sm:$0xff]  ;;  %v444_v18 = vld [vmem:[%s2940_s16 + $0x60] sm:$0xff]  ;;  %v452_v19 = vunpack.c.l.bf16 %v434_v5  ;;  %v453_v20 = vunpack.c.h.bf16 %v434_v5  ;;  %v468_v21 = vunpack.c.l.bf16 %v442_v6  ;;  %v469_v22 = vunpack.c.h.bf16 %v442_v6  ;;  %v445_v28 = vld [vmem:[%s2940_s16 + $0x68] sm:$0xff] }
  0xe3   : > { %v454_v23 = vunpack.c.l.bf16 %v435_v11  ;;  %v455_v24 = vunpack.c.h.bf16 %v435_v11  ;;  %v470_v25 = vunpack.c.l.bf16 %v443_v12  ;;  %v471_v26 = vunpack.c.h.bf16 %v443_v12  ;;  %v438_v37 = vld [vmem:[%s2940_s16 + $0x30] sm:$0xff]  ;;  %v439_v47 = vld [vmem:[%s2940_s16 + $0x38] sm:$0xff] }
  0xe4   : > { %v480_v29 = vadd.f32 %v450_v9, %v448_v7  ;;  %v493_v30 = vadd.f32 %v451_v10, %v449_v8  ;;  %v506_v31 = vadd.f32 %v466_v15, %v464_v13  ;;  %v519_v32 = vadd.f32 %v467_v16, %v465_v14  ;;  %v446_v38 = vld [vmem:[%s2940_s16 + $0x70] sm:$0xff]  ;;  %v447_v48 = vld [vmem:[%s2940_s16 + $0x78] sm:$0xff] }
  0xe5   : > { %v456_v33 = vunpack.c.l.bf16 %v436_v17  ;;  %v457_v34 = vunpack.c.h.bf16 %v436_v17  ;;  %v472_v35 = vunpack.c.l.bf16 %v444_v18  ;;  %v473_v36 = vunpack.c.h.bf16 %v444_v18 }
  0xe6   : > { %v481_v39 = vadd.f32 %v480_v29, %v452_v19  ;;  %v494_v40 = vadd.f32 %v493_v30, %v453_v20  ;;  %v507_v41 = vadd.f32 %v506_v31, %v468_v21  ;;  %v520_v42 = vadd.f32 %v519_v32, %v469_v22  ;;  %p1879_p8 = scmp.ne.s32.totalorder %s3144_s20, 1 }
  0xe7   : > { %v458_v43 = vunpack.c.l.bf16 %v437_v27  ;;  %v459_v44 = vunpack.c.h.bf16 %v437_v27  ;;  %v474_v45 = vunpack.c.l.bf16 %v445_v28  ;;  %v475_v46 = vunpack.c.h.bf16 %v445_v28 }
  0xe8   : > { %v482_v49 = vadd.f32 %v481_v39, %v454_v23  ;;  %v495_v50 = vadd.f32 %v494_v40, %v455_v24  ;;  %v508_v51 = vadd.f32 %v507_v41, %v470_v25  ;;  %v521_v52 = vadd.f32 %v520_v42, %v471_v26 }
  0xe9   : > { %v460_v53 = vunpack.c.l.bf16 %v438_v37  ;;  %v461_v54 = vunpack.c.h.bf16 %v438_v37  ;;  %v476_v55 = vunpack.c.l.bf16 %v446_v38  ;;  %v477_v56 = vunpack.c.h.bf16 %v446_v38 }
  0xea   : > { %v483_v57 = vadd.f32 %v482_v49, %v456_v33  ;;  %v496_v58 = vadd.f32 %v495_v50, %v457_v34  ;;  %v509_v59 = vadd.f32 %v508_v51, %v472_v35  ;;  %v522_v60 = vadd.f32 %v521_v52, %v473_v36  ;;  %v431_v49 = vld [vmem:[#allocation2] sm:$0xf] }
  0xeb   : > { %v462_v61 = vunpack.c.l.bf16 %v439_v47  ;;  %v463_v62 = vunpack.c.h.bf16 %v439_v47  ;;  %v478_v63 = vunpack.c.l.bf16 %v447_v48  ;;  %v479_v0 = vunpack.c.h.bf16 %v447_v48 }
  0xec   : > { %v484_v1 = vadd.f32 %v483_v57, %v458_v43  ;;  %v497_v2 = vadd.f32 %v496_v58, %v459_v44  ;;  %v510_v3 = vadd.f32 %v509_v59, %v474_v45  ;;  %v523_v4 = vadd.f32 %v522_v60, %v475_v46  ;;  %v2204_v57 = vld [vmem:[#allocation8 + $0x10] ss:$8 sps:$4 sm:$0xff] (!%p1879_p8)   ;;  %v2205_v58 = vld [vmem:[#allocation8 + $0x24] ss:$8 sps:$4 sm:$0xff] (!%p1879_p8)   ;;  %v2207_v59 = vld [vmem:[#allocation8 + $0x20] ss:$8 sps:$4 sm:$0xff] (!%p1879_p8)  }
  0xed   : > { %v2609_v17 = vmov 1983009808   ;;  %v540_v19 = vlaneseq  ;;  %vm563_vm3 = vcmask 1047559   ;;  %v2208_v60 = vld [vmem:[#allocation8 + $0x34] ss:$8 sps:$4 sm:$0xff] (!%p1879_p8)   ;;  %vm868_vm4 = vcmask (!%p1879_p8), 1041408  }
  0xee   : > { %v485_v5 = vadd.f32 %v484_v1, %v460_v53  ;;  %v498_v6 = vadd.f32 %v497_v2, %v461_v54  ;;  %v511_v7 = vadd.f32 %v510_v3, %v476_v55  ;;  %v524_v8 = vadd.f32 %v523_v4, %v477_v56  ;;  %v2199_v54 = vld [vmem:[#allocation8 + $0x4] ss:$8 sps:$4 sm:$0xff] (!%p1879_p8)   ;;  %v2201_v55 = vld [vmem:[#allocation8] ss:$8 sps:$4 sm:$0xff] (!%p1879_p8)   ;;  %v2202_v56 = vld [vmem:[#allocation8 + $0x14] ss:$8 sps:$4 sm:$0xff] (!%p1879_p8)  }
  0xef   : > { %v538_v18 = vunpack.c.l.s4 %v2609_v17  ;;  %v2981_v29 = vshrl.u32 %v540_v19, 7  ;;  %827 = vmatprep.subr.bf16.mxu0 (!%p1879_p8), %v2199_v54  ;;  %v2216_v1 = vld [vmem:[#allocation8 + $0x50] ss:$8 sps:$4 sm:$0xff] (!%p1879_p8)   ;;  %v2217_v2 = vld [vmem:[#allocation8 + $0x64] ss:$8 sps:$4 sm:$0xff] (!%p1879_p8)  }
  0xf0   : > { %v486_v9 = vadd.f32 %v485_v5, %v462_v61  ;;  %v499_v10 = vadd.f32 %v498_v6, %v463_v62  ;;  %v512_v11 = vadd.f32 %v511_v7, %v478_v63  ;;  %v525_v12 = vadd.f32 %v524_v8, %v479_v0  ;;  %828 = vmatpush1.bf16.msra.mxu0 (!%p1879_p8), %v2201_v55  ;;  %v2210_v61 = vld [vmem:[#allocation8 + $0x30] ss:$8 sps:$4 sm:$0xff] (!%p1879_p8)   ;;  %v2211_v62 = vld [vmem:[#allocation8 + $0x44] ss:$8 sps:$4 sm:$0xff] (!%p1879_p8)   ;;  %v2213_v63 = vld [vmem:[#allocation8 + $0x40] ss:$8 sps:$4 sm:$0xff] (!%p1879_p8)  }
  0xf1   : > { %v539_v28 = vunpack.c.0.s8 %v538_v18  ;;  %829 = vmatprep.subr.bf16.mxu0 (!%p1879_p8), %v2202_v56  ;;  %v2214_v0 = vld [vmem:[#allocation8 + $0x54] ss:$8 sps:$4 sm:$0xff] (!%p1879_p8)   ;;  %v2219_v3 = vld [vmem:[#allocation8 + $0x60] ss:$8 sps:$4 sm:$0xff] (!%p1879_p8)   ;;  %v2222_v8 = vld [vmem:[#allocation8 + $0x70] ss:$8 sps:$4 sm:$0xff] (!%p1879_p8)  }
  0xf2   : > { %v487_v13 = vrot.slane %v486_v9, 4  ;;  %v500_v14 = vrot.slane %v499_v10, 4  ;;  %v513_v15 = vrot.slane %v512_v11, 4  ;;  %v526_v16 = vrot.slane %v525_v12, 4  ;;  %v2220_v5 = vld [vmem:[#allocation8 + $0x74] ss:$8 sps:$4 sm:$0xff] (!%p1879_p8)  }
  0xf3   : > { %v542_v38 = vsub.s32 %v539_v28, %v2981_v29  ;;  %v2232_v17 = vld [vmem:[#allocation8 + $0xb4] ss:$8 sps:$4 sm:$0xff] (!%p1879_p8)   ;;  %v2234_v18 = vld [vmem:[#allocation8 + $0xb0] ss:$8 sps:$4 sm:$0xff] (!%p1879_p8)   ;;  %v2235_v19 = vld [vmem:[#allocation8 + $0xc4] ss:$8 sps:$4 sm:$0xff] (!%p1879_p8)  }
  0xf4   : > { %v488_v20 = vadd.f32 %v487_v13, %v486_v9  ;;  %v501_v21 = vadd.f32 %v500_v14, %v499_v10  ;;  %v514_v22 = vadd.f32 %v513_v15, %v512_v11  ;;  %v527_v23 = vadd.f32 %v526_v16, %v525_v12  ;;  %830 = vmatpush1.bf16.msra.mxu0 (!%p1879_p8), %v2204_v57  ;;  %v2223_v9 = vld [vmem:[#allocation8 + $0x84] ss:$8 sps:$4 sm:$0xff] (!%p1879_p8)   ;;  %v2225_v12 = vld [vmem:[#allocation8 + $0x80] ss:$8 sps:$4 sm:$0xff] (!%p1879_p8)   ;;  %v2226_v13 = vld [vmem:[#allocation8 + $0x94] ss:$8 sps:$4 sm:$0xff] (!%p1879_p8)  }
  0xf5   : > { %831 = vmatprep.subr.bf16.mxu0 (!%p1879_p8), %v2205_v58  ;;  %v2228_v14 = vld [vmem:[#allocation8 + $0x90] ss:$8 sps:$4 sm:$0xff] (!%p1879_p8)   ;;  %v2229_v15 = vld [vmem:[#allocation8 + $0xa4] ss:$8 sps:$4 sm:$0xff] (!%p1879_p8)   ;;  %v2231_v16 = vld [vmem:[#allocation8 + $0xa0] ss:$8 sps:$4 sm:$0xff] (!%p1879_p8)  }
  0xf6   : > { %v489_v24 = vrot.slane %v488_v20, 2  ;;  %v502_v25 = vrot.slane %v501_v21, 2  ;;  %v515_v26 = vrot.slane %v514_v22, 2  ;;  %v528_v27 = vrot.slane %v527_v23, 2  ;;  %v2247_v28 = vld [vmem:[#allocation9 + $0x40] sm:$0xff] (!%p1879_p8)  }
  0xf7   : > { %1971 = vmatprep.subr.bf16.mxu1 (!%p1879_p8), %v2247_v28 }
  0xf8   : > { %v490_v30 = vadd.f32 %v489_v24, %v488_v20  ;;  %v503_v31 = vadd.f32 %v502_v25, %v501_v21  ;;  %v516_v32 = vadd.f32 %v515_v26, %v514_v22  ;;  %v529_v33 = vadd.f32 %v528_v27, %v527_v23  ;;  %832 = vmatpush1.bf16.msra.mxu0 (!%p1879_p8), %v2207_v59  ;;  %v2237_v20 = vld [vmem:[#allocation8 + $0xc0] ss:$8 sps:$4 sm:$0xff] (!%p1879_p8)   ;;  %v2238_v21 = vld [vmem:[#allocation8 + $0xd4] ss:$8 sps:$4 sm:$0xff] (!%p1879_p8)   ;;  %v2240_v22 = vld [vmem:[#allocation8 + $0xd0] ss:$8 sps:$4 sm:$0xff] (!%p1879_p8)  }
  0xf9   : > { %833 = vmatprep.subr.bf16.mxu0 (!%p1879_p8), %v2208_v60  ;;  %v2241_v23 = vld [vmem:[#allocation8 + $0xe4] ss:$8 sps:$4 sm:$0xff] (!%p1879_p8)   ;;  %v2243_v24 = vld [vmem:[#allocation8 + $0xe0] ss:$8 sps:$4 sm:$0xff] (!%p1879_p8)   ;;  %v2244_v25 = vld [vmem:[#allocation8 + $0xf4] ss:$8 sps:$4 sm:$0xff] (!%p1879_p8)  }
  0xfa   : > { %v491_v34 = vrot.slane %v490_v30, 1  ;;  %v504_v35 = vrot.slane %v503_v31, 1  ;;  %v517_v36 = vrot.slane %v516_v32, 1  ;;  %v530_v37 = vrot.slane %v529_v33, 1  ;;  %v2246_v26 = vld [vmem:[#allocation8 + $0xf0] ss:$8 sps:$4 sm:$0xff] (!%p1879_p8)  }
  0xfc   : > { %v492_v39 = vadd.f32 %v491_v34, %v490_v30  ;;  %v505_v40 = vadd.f32 %v504_v35, %v503_v31  ;;  %v518_v41 = vadd.f32 %v517_v36, %v516_v32  ;;  %v531_v42 = vadd.f32 %v530_v37, %v529_v33  ;;  %834 = vmatpush1.bf16.msra.mxu0 (!%p1879_p8), %v2210_v61  ;;  %v2248_v30 = vld [vmem:[#allocation9] sm:$0xff] (!%p1879_p8)   ;;  %v2249_v31 = vld [vmem:[#allocation9 + $0x48] sm:$0xff] (!%p1879_p8)   ;;  %v2251_v33 = vld [vmem:[#allocation9 + $0x50] sm:$0xff] (!%p1879_p8)  }
  0xfd   : > { %835 = vmatprep.subr.bf16.mxu0 (!%p1879_p8), %v2211_v62  ;;  %1972 = vmatpush3.bf16.msra.mxu1 (!%p1879_p8), %v2248_v30  ;;  %v2250_v32 = vld [vmem:[#allocation9 + $0x8] sm:$0xff] (!%p1879_p8)   ;;  %v2252_v34 = vld [vmem:[#allocation9 + $0x10] sm:$0xff] (!%p1879_p8)   ;;  %v2253_v35 = vld [vmem:[#allocation9 + $0x58] sm:$0xff] (!%p1879_p8)  }
  0xfe   : > { %v536_v43 = vcombine.low %v492_v39, %v505_v40  ;;  %v544_v44 = vcombine.low %v518_v41, %v531_v42  ;;  %1973 = vmatprep.subr.bf16.mxu1 (!%p1879_p8), %v2249_v31  ;;  %v2254_v36 = vld [vmem:[#allocation9 + $0x18] sm:$0xff] (!%p1879_p8)   ;;  %v2255_v37 = vld [vmem:[#allocation9 + $0x60] sm:$0xff] (!%p1879_p8)   ;;  %v2257_v39 = vld [vmem:[#allocation9 + $0x68] sm:$0xff] (!%p1879_p8)  }
  0xff   : > { %v2258_v40 = vld [vmem:[#allocation9 + $0x28] sm:$0xff] (!%p1879_p8)   ;;  %v2259_v41 = vld [vmem:[#allocation9 + $0x70] sm:$0xff] (!%p1879_p8)  }
 0x100   : > { %v543_v45 = vrot.slane %v536_v43, %v542_v38  ;;  %v551_v46 = vrot.slane %v544_v44, %v542_v38  ;;  %836 = vmatpush1.bf16.msra.mxu0 (!%p1879_p8), %v2213_v63  ;;  %v2260_v42 = vld [vmem:[#allocation9 + $0x30] sm:$0xff] (!%p1879_p8)   ;;  %v2261_v43 = vld [vmem:[#allocation9 + $0x78] sm:$0xff] (!%p1879_p8)  }
 0x101   : > { %837 = vmatprep.subr.bf16.mxu0 (!%p1879_p8), %v2214_v0  ;;  %1974 = vmatpush3.bf16.msra.mxu1 (!%p1879_p8), %v2250_v32  ;;  %v2262_v44 = vld [vmem:[#allocation9 + $0x38] sm:$0xff] (!%p1879_p8)  }
 0x102   : > { %v556_v47 = vrot.slane %v551_v46, 7  ;;  %1975 = vmatprep.subr.bf16.mxu1 (!%p1879_p8), %v2251_v33  ;;  %v622_v32 = vld [vmem:[#allocation8 + $0x100] sm:$0x22] (!%p1879_p8)  ;;  %v914_v33 = vsub.s32 (!%p1879_p8), 1, %v2981_v29 }
 0x104   : > { %v558_v48 = vsel %vm557_vm0, %v556_v47, %v543_v45  ;;  %571 = sbr.rel (%p1879_p8) target bundleno = 954 (0x3ba), region = 84  ;;  %838 = vmatpush1.bf16.msra.mxu0 (!%p1879_p8), %v2216_v1  ;;  %v619_v45 = vld [vmem:[#allocation8 + $0x100] sm:$0x11] (!%p1879_p8) }
 0x105   : > { %v560_v50 = vsel %vm559_vm1, %v556_v47, %v558_v48  ;;  %839 = vmatprep.subr.bf16.mxu0 (!%p1879_p8), %v2217_v2  ;;  %1976 = vmatpush3.bf16.msra.mxu1 (!%p1879_p8), %v2252_v34  ;;  %v620_v46 = vunpack.c.l.bf16 (!%p1879_p8), %v619_v45  ;;  %v621_v48 = vunpack.c.h.bf16 (!%p1879_p8), %v619_v45  ;;  %v623_v34 = vunpack.c.l.bf16 (!%p1879_p8), %v622_v32 }
 0x106   : > { %v562_v51 = vsel %vm561_vm2, %v556_v47, %v560_v50  ;;  %1977 = vmatprep.subr.bf16.mxu1 (!%p1879_p8), %v2253_v35  ;;  %v924_v35 = vsub.s32 (!%p1879_p8), 2, %v2981_v29 }
 0x107   : > { %v564_v52 = vsel %vm563_vm3, %v556_v47, %v562_v51  ;;  %v2986_v47 = vsub.s32 (!%p1879_p8), 0, %v2981_v29  ;;  %v657_v29 = vld [vmem:[#allocation9 + $0x80] sm:$0x1] (!%p1879_p8) }
 0x108   : > { %v566_v53 = vadd.f32 %v564_v52, %v431_v49  ;;  %840 = vmatpush1.bf16.msra.mxu0 (!%p1879_p8), %v2219_v3 }
 0x109   : > { %841 = vmatprep.subr.bf16.mxu0 (!%p1879_p8), %v2220_v5  ;;  %1978 = vmatpush3.bf16.msra.mxu1 (!%p1879_p8), %v2254_v36  ;;  %v662_v49 = vrot.slane (!%p1879_p8), %v620_v46, %v2986_v47  ;;  %v666_v50 = vrot.slane (!%p1879_p8), %v621_v48, %v2986_v47  ;;  %v624_v36 = vunpack.c.h.bf16 (!%p1879_p8), %v622_v32 }
 0x10a   : > { %567 = vst [vmem:[#allocation2] sm:$0xf] %v566_v53  ;;  %1979 = vmatprep.subr.bf16.mxu1 (!%p1879_p8), %v2255_v37  ;;  %v915_v37 = vrot.slane (!%p1879_p8), %v620_v46, %v914_v33 }
 0x10c   : > { %842 = vmatpush1.bf16.msra.mxu0 %v2222_v8 }
 0x10d   : > { %843 = vmatprep.subr.bf16.mxu0 %v2223_v9 }
 0x110   : > { %844 = vmatpush1.bf16.msra.mxu0 %v2225_v12 }
 0x111   : > { %v572_v4 = vld [vmem:[#allocation2] sm:$0xf]  ;;  %845 = vmatprep.subr.bf16.mxu0 %v2226_v13 }
 0x112   : > { %v573_v6 = vmul.f32 0.0078125, %v572_v4 }
 0x114   : > { %v581_v7 = vrot.slane %v573_v6, %v542_v38  ;;  %846 = vmatpush1.bf16.msra.mxu0 %v2228_v14  ;;  %v2256_v38 = vld [vmem:[#allocation9 + $0x20] sm:$0xff]  }
 0x115   : > { %847 = vmatprep.subr.bf16.mxu0 %v2229_v15  ;;  %1980 = vmatpush3.bf16.msra.mxu1 %v2256_v38 }
 0x116   : > { %v582_v10 = vcombine.high %v581_v7, %v581_v7  ;;  %v585_v27 = vpack.c.bf16 %v581_v7, %v581_v7  ;;  %1981 = vmatprep.subr.bf16.mxu1 %v2257_v39  ;;  %v919_v39 = vrot.slane %v621_v48, %v914_v33 }
 0x118   : > { %v586_v11 = vpack.c.bf16 %v582_v10, %v582_v10  ;;  %848 = vmatpush1.bf16.msra.mxu0 %v2231_v16 }
 0x119   : > { %849 = vmatprep.subr.bf16.mxu0 %v2232_v17  ;;  %1982 = vmatpush3.bf16.msra.mxu1 %v2258_v40 }
 0x11a   : > { %859 = vmatprep.mubr.bf16.mxu0 %v586_v11  ;;  %1983 = vmatprep.subr.bf16.mxu1 %v2259_v41 }
 0x11c   : > { %850 = vmatpush1.bf16.msra.mxu0 %v2234_v18 }
 0x11d   : > { %851 = vmatprep.subr.bf16.mxu0 %v2235_v19  ;;  %1984 = vmatpush3.bf16.msra.mxu1 %v2260_v42  ;;  %v925_v42 = vrot.slane %v623_v34, %v924_v35 }
 0x11e   : > { %1985 = vmatprep.subr.bf16.mxu1 %v2261_v43 }
 0x120   : > { %852 = vmatpush1.bf16.msra.mxu0 %v2237_v20 }
 0x121   : > { %853 = vmatprep.subr.bf16.mxu0 %v2238_v21  ;;  %1986 = vmatpush3.bf16.msra.mxu1 %v2262_v44  ;;  %v929_v44 = vrot.slane %v624_v36, %v924_v35 }
 0x124   : > { %854 = vmatpush1.bf16.msra.mxu0 %v2240_v22 }
 0x125   : > { %855 = vmatprep.subr.bf16.mxu0 %v2241_v23 }
 0x128   : > { %856 = vmatpush1.bf16.msra.mxu0 %v2243_v24 }
 0x129   : > { %857 = vmatprep.subr.bf16.mxu0 %v2244_v25 }
 0x12c   : > { %858 = vmatpush1.bf16.msra.mxu0 %v2246_v26 }
 0x12f   : > { %860 = vmatmul.mubr.bf16.vlgmr.msra.gmra.mrb[0].mxu0 %v585_v27 }
 0x202   : > { %v861_v51 = vpop.f32.mrb[0].mxu0 }
 0x203   : > { %v862_v52 = vadd.f32 %v861_v51, %v662_v49  ;;  %v863_v53 = vpop.f32.mrb[1].mxu0 }
 0x204   : > { %v864_v54 = vadd.f32 %v863_v53, %v666_v50  ;;  %v865_v55 = vpop.f32.mrb[2].mxu0 }
 0x205   : > { %v869_v56 = vsel %vm868_vm4, %v862_v52, 0.0  ;;  %v866_v57 = vpop.f32.mrb[3].mxu0 }
 0x206   : > { %v870_v58 = vrot.slane %v869_v56, 4  ;;  %v876_v59 = vsel %vm868_vm4, %v864_v54, 0.0 }
 0x207   : > { %v877_v60 = vrot.slane %v876_v59, 4 }
 0x208   : > { %v871_v61 = vadd.f32 %v870_v58, %v869_v56  ;;  %v658_v56 = vunpack.c.l.bf16 %v657_v29 }
 0x209   : > { %v878_v62 = vadd.f32 %v877_v60, %v876_v59 }
 0x20a   : > { %v872_v63 = vrot.slane %v871_v61, 2  ;;  %v939_v48 = vrot.slane %v658_v56, %v2986_v47 }
 0x20b   : > { %v879_v0 = vrot.slane %v878_v62, 2 }
 0x20c   : > { %v873_v1 = vadd.f32 %v872_v63, %v871_v61 }
 0x20d   : > { %v880_v2 = vadd.f32 %v879_v0, %v878_v62 }
 0x20e   : > { %v874_v3 = vrot.slane %v873_v1, 1 }
 0x20f   : > { %v881_v4 = vrot.slane %v880_v2, 1 }
 0x210   : > { %v875_v5 = vadd.f32 %v874_v3, %v873_v1 }
 0x211   : > { %v882_v6 = vadd.f32 %v881_v4, %v880_v2 }
 0x212   : > { %v884_v7 = vmul.f32 0.5, %v875_v5 }
 0x213   : > { %v885_v8 = vmul.f32 0.5, %v882_v6 }
 0x214   : > { %v886_v9 = vsub.f32 %v862_v52, %v884_v7 }
 0x215   : > { %v887_v10 = vsub.f32 %v864_v54, %v885_v8 }
 0x216   : > { %v888_v11 = vmul.f32 %v886_v9, %v886_v9 }
 0x217   : > { %v889_v12 = vmul.f32 %v887_v10, %v887_v10 }
 0x218   : > { %v890_v13 = vsel %vm868_vm4, %v888_v11, 0.0 }
 0x219   : > { %v891_v14 = vrot.slane %v890_v13, 4  ;;  %v897_v15 = vsel %vm868_vm4, %v889_v12, 0.0 }
 0x21a   : > { %v898_v16 = vrot.slane %v897_v15, 4 }
 0x21b   : > { %v892_v17 = vadd.f32 %v891_v14, %v890_v13 }
 0x21c   : > { %v899_v18 = vadd.f32 %v898_v16, %v897_v15 }
 0x21d   : > { %v893_v19 = vrot.slane %v892_v17, 2 }
 0x21e   : > { %v900_v20 = vrot.slane %v899_v18, 2 }
 0x21f   : > { %v894_v21 = vadd.f32 %v893_v19, %v892_v17 }
 0x220   : > { %v901_v22 = vadd.f32 %v900_v20, %v899_v18 }
 0x221   : > { %v895_v23 = vrot.slane %v894_v21, 1 }
 0x222   : > { %v902_v24 = vrot.slane %v901_v22, 1 }
 0x223   : > { %v896_v25 = vadd.f32 %v895_v23, %v894_v21 }
 0x224   : > { %v903_v26 = vadd.f32 %v902_v24, %v901_v22 }
 0x225   : > { %v904_v27 = vmul.f32 0.5, %v896_v25 }
 0x226   : > { %v905_v28 = vmul.f32 0.5, %v903_v26 }
 0x227   : > { %v906_v30 = vadd.f32 1e-05, %v904_v27 }
 0x228   : > { %v907_v31 = vadd.f32 1e-05, %v905_v28 }
 0x229   : > { %2263 = vrsqrt.f32 %v906_v30 }
 0x22a   : > { %2265 = vrsqrt.f32 %v907_v31 }
 0x233   : > { %v2264_v38 = vpop.eup %2263 }
 0x234   : > { %v2266_v40 = vpop.eup %2265  ;;  %v910_v41 = vmul.f32 %v2264_v38, %v886_v9 }
 0x235   : > { %v911_v43 = vmul.f32 %v2266_v40, %v887_v10 }
 0x236   : > { %v920_v45 = vmul.f32 %v915_v37, %v910_v41 }
 0x237   : > { %v921_v49 = vmul.f32 %v919_v39, %v911_v43 }
 0x238   : > { %v930_v50 = vadd.f32 %v925_v42, %v920_v45 }
 0x239   : > { %v931_v51 = vadd.f32 %v929_v44, %v921_v49 }
 0x23a   : > { %v932_v52 = vmax.f32 %v930_v50, 0.0 }
 0x23b   : > { %v933_v53 = vmax.f32 %v931_v51, 0.0 }
 0x23c   : > { %v934_v55 = vpack.c.bf16 %v932_v52, %v932_v52 }
 0x23d   : > { %v935_v54 = vpack.c.bf16 %v933_v53, %v933_v53 }
 0x23f   : > { %1068 = vmatprep.mubr.bf16.mxu1 %v935_v54 }
 0x240   : > { %1069 = vmatmul.mubr.bf16.vlgmr.msra.gmra.mrb[0].mxu1 %v934_v55 }
 0x313   : > { %v1987_v46 = vpop.f32.mrb[0].mxu1 }
 0x314   : > { %v1988_v57 = vpop.f32.mrb[1].mxu1 }
 0x315   : > { %v1989_v58 = vadd.f32 %v1988_v57, %v1987_v46  ;;  %v1990_v59 = vpop.f32.mrb[2].mxu1 }
 0x316   : > { %v1991_v60 = vpop.f32.mrb[3].mxu1 }
 0x317   : > { %v1071_v61 = vadd.f32 %v1989_v58, %v939_v48 }
 0x319   : > { %v1076_v62 = vmul.f32 %v1071_v61, %v1071_v61 }
 0x31b   : > { %v1077_v63 = vsel %vm868_vm4, %v1076_v62, 0.0 }
 0x31c   : > { %1078 = vadd.xlane.f32.xlu0 %v1077_v63 }
 0x3a9   : > { %v1079_v0 = vpop.xlane.xlu0 %1078 }
 0x3aa   : > { %v1080_v1 = vmax.f32 %v1079_v0, 1e-24 }
 0x3ac   : > { %2267 = vrsqrt.f32 %v1080_v1 }
 0x3b6   : > { %v2268_v2 = vpop.eup %2267 }
 0x3b7   : > { %v1082_v3 = vmul.f32 %v2268_v2, %v1071_v61 }
 0x3b9   : > { %1083 = vst [vmem:[%s2961_s12] sm:$0x3] %v1082_v3 }
 0x3ba PF: > { %s3145_s30 = sld [smem:[#allocation26_spill]] }
 0x3c0   : > { %p1928_p10 = scmp.ne.s32.totalorder %s3145_s30, 1 }
 0x3c1   : > { %s3146_s27 = sld [smem:[#allocation25_spill]] (!%p1928_p10) }
 0x3c2   : > { %1087 = sbr.rel (%p1928_p10) target bundleno = 1880 (0x758), region = 88 }
 0x3c7   : > { %p1929_p12 = scmp.ne.s32.totalorder (!%p1928_p10), %s3146_s27, 1 }
 0x3c9   : > { %1091 = sbr.rel (%p1929_p12) target bundleno = 1880 (0x758), region = 92  ;;  %v2269_v47 = vld [vmem:[#allocation11 + $0x4] ss:$8 sps:$4 sm:$0xff] (!%p1929_p12)   ;;  %v2271_v4 = vld [vmem:[#allocation11] ss:$8 sps:$4 sm:$0xff] (!%p1929_p12)   ;;  %v2610_v5 = vmov (!%p1929_p12), 0   ;;  %v1159_v41 = vlaneseq (!%p1929_p12) }
 0x3ca   : > { %1285 = vmatprep.mubr.bf16.mxu0 (!%p1929_p12), %v2610_v5  ;;  %1253 = vmatprep.subr.bf16.mxu0 (!%p1929_p12), %v2269_v47  ;;  %v2272_v6 = vld [vmem:[#allocation11 + $0x14] ss:$8 sps:$4 sm:$0xff] (!%p1929_p12)   ;;  %v2274_v7 = vld [vmem:[#allocation11 + $0x10] ss:$8 sps:$4 sm:$0xff] (!%p1929_p12)   ;;  %v2275_v8 = vld [vmem:[#allocation11 + $0x24] ss:$8 sps:$4 sm:$0xff] (!%p1929_p12)  }
 0x3cb   : > { %1254 = vmatpush1.bf16.msra.mxu0 (!%p1929_p12), %v2271_v4  ;;  %v2277_v9 = vld [vmem:[#allocation11 + $0x20] ss:$8 sps:$4 sm:$0xff] (!%p1929_p12)   ;;  %v2278_v10 = vld [vmem:[#allocation11 + $0x34] ss:$8 sps:$4 sm:$0xff] (!%p1929_p12)   ;;  %v2280_v11 = vld [vmem:[#allocation11 + $0x30] ss:$8 sps:$4 sm:$0xff] (!%p1929_p12)  }
 0x3cc   : > { %1255 = vmatprep.subr.bf16.mxu0 (!%p1929_p12), %v2272_v6  ;;  %v2281_v12 = vld [vmem:[#allocation11 + $0x44] ss:$8 sps:$4 sm:$0xff] (!%p1929_p12)   ;;  %v2283_v13 = vld [vmem:[#allocation11 + $0x40] ss:$8 sps:$4 sm:$0xff] (!%p1929_p12)   ;;  %v2284_v14 = vld [vmem:[#allocation11 + $0x54] ss:$8 sps:$4 sm:$0xff] (!%p1929_p12)  }
 0x3cd   : > { %v2286_v15 = vld [vmem:[#allocation11 + $0x50] ss:$8 sps:$4 sm:$0xff] (!%p1929_p12)   ;;  %v2287_v16 = vld [vmem:[#allocation11 + $0x64] ss:$8 sps:$4 sm:$0xff] (!%p1929_p12)   ;;  %v2289_v17 = vld [vmem:[#allocation11 + $0x60] ss:$8 sps:$4 sm:$0xff] (!%p1929_p12)  }
 0x3ce   : > { %v2290_v18 = vld [vmem:[#allocation11 + $0x74] ss:$8 sps:$4 sm:$0xff] (!%p1929_p12)   ;;  %v2292_v19 = vld [vmem:[#allocation11 + $0x70] ss:$8 sps:$4 sm:$0xff] (!%p1929_p12)   ;;  %v2294_v21 = vld [vmem:[#allocation12 + $0x40] sm:$0xff] (!%p1929_p12)   ;;  %s3147_s13 = sld [smem:[#allocation35_spill]] (!%p1929_p12) }
 0x3cf   : > { %1256 = vmatpush1.bf16.msra.mxu0 (!%p1929_p12), %v2274_v7  ;;  %v2293_v20 = vld [vmem:[#allocation6] sm:$0xff] (!%p1929_p12)   ;;  %1993 = vmatprep.subr.bf16.mxu1 (!%p1929_p12), %v2294_v21  ;;  %v2298_v25 = vld [vmem:[#allocation12 + $0x50] sm:$0xff] (!%p1929_p12)   ;;  %v2300_v27 = vld [vmem:[#allocation12 + $0x58] sm:$0xff] (!%p1929_p12)   ;;  %vm1094_vm5 = vcmask (!%p1929_p12), 58368   ;;  %v3007_v42 = vshrl.u32 (!%p1929_p12), %v1159_v41, 7  ;;  %vm2612_vm6 = vmmov (!%p1929_p12), 0  }
 0x3d0   : > { %1257 = vmatprep.subr.bf16.mxu0 %v2275_v8  ;;  %v2295_v22 = vld [vmem:[#allocation12] sm:$0xff]   ;;  %v2296_v23 = vld [vmem:[#allocation12 + $0x48] sm:$0xff]   ;;  %v2299_v26 = vld [vmem:[#allocation12 + $0x10] sm:$0xff]   ;;  %vm1539_vm7 = vcmask 64512   ;;  %vm1689_vm8 = vcmask 1041409   ;;  %vm1692_vm9 = vcmask 1041408  }
 0x3d1   : > { %1994 = vmatpush3.bf16.msra.mxu1 %v2295_v22  ;;  %v2297_v24 = vld [vmem:[#allocation12 + $0x8] sm:$0xff]   ;;  %v2301_v28 = vld [vmem:[#allocation12 + $0x18] sm:$0xff]   ;;  %v2302_v30 = vld [vmem:[#allocation12 + $0x60] sm:$0xff]   ;;  %v3013_v45 = vsub.s32 0, %v3007_v42 }
 0x3d2   : > { %1995 = vmatprep.subr.bf16.mxu1 %v2296_v23  ;;  %v2303_v31 = vld [vmem:[#allocation12 + $0x20] sm:$0xff]   ;;  %v2304_v32 = vld [vmem:[#allocation12 + $0x68] sm:$0xff]   ;;  %v2306_v34 = vld [vmem:[#allocation12 + $0x70] sm:$0xff]  }
 0x3d3   : > { %1258 = vmatpush1.bf16.msra.mxu0 %v2277_v9  ;;  %v2305_v33 = vld [vmem:[#allocation12 + $0x28] sm:$0xff]   ;;  %v2307_v35 = vld [vmem:[#allocation12 + $0x30] sm:$0xff]   ;;  %v2308_v36 = vld [vmem:[#allocation12 + $0x78] sm:$0xff]  }
 0x3d4   : > { %1259 = vmatprep.subr.bf16.mxu0 %v2278_v10  ;;  %v2309_v37 = vld [vmem:[#allocation12 + $0x38] sm:$0xff]   ;;  %v3004_v38 = vld [vmem:[%s3147_s13] sm:$0x3] }
 0x3d5   : > { %1996 = vmatpush3.bf16.msra.mxu1 %v2297_v24  ;;  %v1093_v39 = vand.u32 2147483647, %v3004_v38  ;;  %v3009_v43 = vld [vmem:[#allocation11 + $0x80] sm:$0x11] }
 0x3d6   : > { %1997 = vmatprep.subr.bf16.mxu1 %v2298_v25  ;;  %v1120_v44 = vunpack.c.l.bf16 %v3009_v43  ;;  %v1121_v49 = vunpack.c.h.bf16 %v3009_v43 }
 0x3d7   : > { %1260 = vmatpush1.bf16.msra.mxu0 %v2280_v11  ;;  %v1095_v40 = vsel %vm1094_vm5, %v1093_v39, 0.0  ;;  %v1359_v39 = vsub.s32 2, %v3007_v42 }
 0x3d8   : > { %1261 = vmatprep.subr.bf16.mxu0 %v2281_v12  ;;  %1096 = vadd.xlane.f32.xlu0 %v1095_v40  ;;  %v1162_v50 = vrot.slane %v1120_v44, %v3013_v45  ;;  %v1166_v52 = vrot.slane %v1121_v49, %v3013_v45 }
 0x3d9   : > { %1998 = vmatpush3.bf16.msra.mxu1 %v2299_v26 }
 0x3da   : > { %1999 = vmatprep.subr.bf16.mxu1 %v2300_v27 }
 0x3db   : > { %1262 = vmatpush1.bf16.msra.mxu0 %v2283_v13 }
 0x3dc   : > { %1263 = vmatprep.subr.bf16.mxu0 %v2284_v14 }
 0x3dd   : > { %2000 = vmatpush3.bf16.msra.mxu1 %v2301_v28 }
 0x3de   : > { %2001 = vmatprep.subr.bf16.mxu1 %v2302_v30 }
 0x3df   : > { %1264 = vmatpush1.bf16.msra.mxu0 %v2286_v15 }
 0x3e0   : > { %1265 = vmatprep.subr.bf16.mxu0 %v2287_v16 }
 0x3e1   : > { %2002 = vmatpush3.bf16.msra.mxu1 %v2303_v31 }
 0x3e2   : > { %2003 = vmatprep.subr.bf16.mxu1 %v2304_v32 }
 0x3e3   : > { %1266 = vmatpush1.bf16.msra.mxu0 %v2289_v17 }
 0x3e4   : > { %1267 = vmatprep.subr.bf16.mxu0 %v2290_v18 }
 0x3e5   : > { %2004 = vmatpush3.bf16.msra.mxu1 %v2305_v33 }
 0x3e6   : > { %2005 = vmatprep.subr.bf16.mxu1 %v2306_v34 }
 0x3e7   : > { %1268 = vmatpush1.bf16.msra.mxu0 %v2292_v19 }
 0x3e9   : > { %2006 = vmatpush3.bf16.msra.mxu1 %v2307_v35  ;;  %v1122_v35 = vld [vmem:[#allocation11 + $0x80] sm:$0x22] }
 0x3ea   : > { %1286 = vmatmul.mubr.bf16.vlgmr.msra.gmra.mrb[0].mxu0 %v2293_v20  ;;  %2007 = vmatprep.subr.bf16.mxu1 %v2308_v36  ;;  %v1347_v36 = vsub.s32 1, %v3007_v42  ;;  %v1124_v40 = vunpack.c.h.bf16 %v1122_v35 }
 0x3ec   : > { %v1348_v41 = vrot.slane %v1120_v44, %v1347_v36 }
 0x3ed   : > { %2008 = vmatpush3.bf16.msra.mxu1 %v2309_v37  ;;  %v1123_v37 = vunpack.c.l.bf16 %v1122_v35 }
 0x4bd   : > { %v1287_v51 = vpop.f32.mrb[0].mxu0 }
 0x4be   : > { %v1289_v53 = vpop.f32.mrb[1].mxu0  ;;  %v1288_v55 = vadd.f32 %v1287_v51, %v1162_v50 }
 0x4bf   : > { %v1291_v54 = vpop.f32.mrb[2].mxu0  ;;  %v1290_v46 = vadd.f32 %v1289_v53, %v1166_v52 }
 0x4c0   : > { %v1292_v29 = vadd.f32 %v1291_v54, %v1162_v50  ;;  %v1293_v56 = vpop.f32.mrb[3].mxu0  ;;  %v1352_v50 = vrot.slane %v1121_v49, %v1347_v36  ;;  %v1360_v54 = vrot.slane %v1123_v37, %v1359_v39 }
 0x4c1   : > { %v1294_v48 = vadd.f32 %v1293_v56, %v1166_v52  ;;  %v1364_v56 = vrot.slane %v1124_v40, %v1359_v39 }
 0x4c2   : > { %v1296_v57 = vadd.f32 %v1292_v29, %v1288_v55 }
 0x4c3   : > { %v1303_v58 = vadd.f32 %v1294_v48, %v1290_v46 }
 0x4c4   : > { %v1297_v59 = vrot.slane %v1296_v57, 4 }
 0x4c5   : > { %v1304_v60 = vrot.slane %v1303_v58, 4 }
 0x4c6   : > { %v1298_v61 = vadd.f32 %v1297_v59, %v1296_v57 }
 0x4c7   : > { %v1305_v62 = vadd.f32 %v1304_v60, %v1303_v58 }
 0x4c8   : > { %v1299_v63 = vrot.slane %v1298_v61, 2 }
 0x4c9   : > { %v1306_v0 = vrot.slane %v1305_v62, 2 }
 0x4ca   : > { %v1300_v1 = vadd.f32 %v1299_v63, %v1298_v61 }
 0x4cb   : > { %v1307_v2 = vadd.f32 %v1306_v0, %v1305_v62 }
 0x4cc   : > { %v1301_v3 = vrot.slane %v1300_v1, 1 }
 0x4cd   : > { %v1308_v47 = vrot.slane %v1307_v2, 1 }
 0x4ce   : > { %v1302_v4 = vadd.f32 %v1301_v3, %v1300_v1  ;;  %v2611_v3 = vmov 0.0  }
 0x4cf   : > { %v1309_v5 = vadd.f32 %v1308_v47, %v1307_v2  ;;  %2019 = vmatprep.subr.mxu0 %v2611_v3  ;;  %2024 = vmatprep.subr.mxu1 %v2611_v3  ;;  %v1097_v47 = vpop.xlane.xlu0 %1096 }
 0x4d0   : > { %v1311_v6 = vmul.f32 0.0625, %v1302_v4  ;;  %2021 = vmatprep.mubr.msk.f32.mxu0 %vm2612_vm6, %v2611_v3  ;;  %v1098_v4 = vmax.f32 %v1097_v47, 1e-12 }
 0x4d1   : > { %v1312_v7 = vmul.f32 0.0625, %v1309_v5  ;;  %v2613_v5 = vmov 1966171168  }
 0x4d2   : > { %v1313_v8 = vsub.f32 %v1288_v55, %v1311_v6  ;;  %v1315_v9 = vsub.f32 %v1292_v29, %v1311_v6  ;;  %v1518_v6 = vunpack.c.l.s4 %v2613_v5 }
 0x4d3   : > { %v1314_v10 = vsub.f32 %v1290_v46, %v1312_v7  ;;  %v1316_v11 = vsub.f32 %v1294_v48, %v1312_v7 }
 0x4d4   : > { %v1317_v12 = vmul.f32 %v1313_v8, %v1313_v8  ;;  %v1319_v13 = vmul.f32 %v1315_v9, %v1315_v9  ;;  %v1519_v7 = vunpack.c.0.s8 %v1518_v6 }
 0x4d5   : > { %v1318_v14 = vmul.f32 %v1314_v10, %v1314_v10  ;;  %v1320_v15 = vmul.f32 %v1316_v11, %v1316_v11 }
 0x4d6   : > { %v1321_v16 = vadd.f32 %v1319_v13, %v1317_v12 }
 0x4d7   : > { %v1328_v17 = vadd.f32 %v1320_v15, %v1318_v14 }
 0x4d8   : > { %v1322_v18 = vrot.slane %v1321_v16, 4 }
 0x4d9   : > { %v1329_v19 = vrot.slane %v1328_v17, 4 }
 0x4da   : > { %v1323_v20 = vadd.f32 %v1322_v18, %v1321_v16 }
 0x4db   : > { %v1330_v21 = vadd.f32 %v1329_v19, %v1328_v17 }
 0x4dc   : > { %v1324_v22 = vrot.slane %v1323_v20, 2 }
 0x4dd   : > { %v1331_v23 = vrot.slane %v1330_v21, 2 }
 0x4de   : > { %v1325_v24 = vadd.f32 %v1324_v22, %v1323_v20 }
 0x4df   : > { %v1332_v25 = vadd.f32 %v1331_v23, %v1330_v21 }
 0x4e0   : > { %v1326_v26 = vrot.slane %v1325_v24, 1 }
 0x4e1   : > { %v1333_v27 = vrot.slane %v1332_v25, 1 }
 0x4e2   : > { %v1327_v28 = vadd.f32 %v1326_v26, %v1325_v24 }
 0x4e3   : > { %v1334_v30 = vadd.f32 %v1333_v27, %v1332_v25 }
 0x4e4   : > { %v1335_v31 = vmul.f32 0.0625, %v1327_v28 }
 0x4e5   : > { %v1336_v32 = vmul.f32 0.0625, %v1334_v30 }
 0x4e6   : > { %v1337_v33 = vadd.f32 1e-05, %v1335_v31 }
 0x4e7   : > { %v1338_v34 = vadd.f32 1e-05, %v1336_v32 }
 0x4e8   : > { %2310 = vrsqrt.f32 %v1337_v33 }
 0x4e9   : > { %2312 = vrsqrt.f32 %v1338_v34 }
 0x4ea   : > { %2314 = vrcp.f32 %v1098_v4 }
 0x4f2   : > { %v2311_v43 = vpop.eup %2310 }
 0x4f3   : > { %v2313_v51 = vpop.eup %2312  ;;  %v1341_v52 = vmul.f32 %v2311_v43, %v1313_v8  ;;  %v1343_v53 = vmul.f32 %v2311_v43, %v1315_v9  ;;  %v1522_v9 = vsub.s32 %v1519_v7, %v3007_v42 }
 0x4f4   : > { %v1344_v55 = vmul.f32 %v2313_v51, %v1316_v11  ;;  %v1342_v29 = vmul.f32 %v2313_v51, %v1314_v10  ;;  %v2315_v8 = vpop.eup %2314  ;;  %v1157_v11 = vld [vmem:[#allocation12 + $0x80] sm:$0x1] }
 0x4f5   : > { %v1355_v46 = vmul.f32 %v1348_v41, %v1343_v53  ;;  %v1353_v48 = vmul.f32 %v1348_v41, %v1341_v52  ;;  %v1100_v10 = vmul.f32 %v2315_v8, %v3004_v38  ;;  %v1158_v12 = vunpack.c.l.bf16 %v1157_v11 }
 0x4f6   : > { %v1354_v57 = vmul.f32 %v1352_v50, %v1342_v29  ;;  %v1356_v58 = vmul.f32 %v1352_v50, %v1344_v55 }
 0x4f7   : > { %v1365_v59 = vadd.f32 %v1360_v54, %v1353_v48  ;;  %v1367_v60 = vadd.f32 %v1360_v54, %v1355_v46  ;;  %v1523_v13 = vrot.slane %v1100_v10, %v1522_v9  ;;  %v1378_v15 = vrot.slane %v1158_v12, %v3013_v45 }
 0x4f8   : > { %v1366_v61 = vadd.f32 %v1364_v56, %v1354_v57  ;;  %v1368_v62 = vadd.f32 %v1364_v56, %v1356_v58 }
 0x4f9   : > { %v1369_v63 = vmax.f32 %v1365_v59, 0.0  ;;  %v1371_v0 = vmax.f32 %v1367_v60, 0.0  ;;  %v1524_v17 = vcombine.high %v1523_v13, %v1523_v13  ;;  %v1531_v21 = vrot.slane %v1523_v13, %v1522_v9 }
 0x4fa   : > { %v1370_v44 = vmax.f32 %v1366_v61, 0.0  ;;  %v1372_v1 = vmax.f32 %v1368_v62, 0.0 }
 0x4fb   : > { %v1373_v49 = vpack.c.bf16 %v1371_v0, %v1369_v63  ;;  %v1538_v24 = vrot.slane %v1524_v17, %v1522_v9 }
 0x4fc   : > { %v1374_v2 = vpack.c.bf16 %v1372_v1, %v1370_v44 }
 0x4fe   : > { %1507 = vmatprep.mubr.bf16.mxu1 %v1374_v2 }
 0x4ff   : > { %1508 = vmatmul.mubr.bf16.vlgmr.msra.gmra.mrb[0].mxu1 %v1373_v49 }
 0x500   : > { %2026 = vmatprep.mubr.msk.f32.mxu1 %vm2612_vm6, %v2611_v3 }
 0x5d2   : > { %v2009_v14 = vpop.f32.mrb[0].mxu1 }
 0x5d3   : > { %v2010_v16 = vpop.f32.mrb[1].mxu1 }
 0x5d4   : > { %v2011_v18 = vadd.f32 %v2010_v16, %v2009_v14  ;;  %v2012_v19 = vpop.f32.mrb[2].mxu1 }
 0x5d5   : > { %v2013_v20 = vpop.f32.mrb[3].mxu1 }
 0x5d6   : > { %v1510_v22 = vadd.f32 %v2011_v18, %v1378_v15  ;;  %v2014_v23 = vadd.f32 %v2013_v20, %v2012_v19 }
 0x5d8   : > { %v1513_v25 = vadd.f32 %v2014_v23, %v1378_v15  ;;  %2020 = vmatpush3.msra.mxu0 %v1510_v22 }
 0x5d9   : > { %2022 = vmatmul.mubr.msk.f32.vlgmr.msra.gmra.mrb[4].mxu0 %vm1539_vm7, %v1531_v21 }
 0x5da   : > { %2025 = vmatpush3.msra.mxu1 %v1513_v25 }
 0x5db   : > { %2027 = vmatmul.mubr.msk.f32.vlgmr.msra.gmra.mrb[4].mxu1 %vm1539_vm7, %v1538_v24 }
 0x6ac   : > { %v1608_v38 = vpop.f32.mrb[4].mxu0 }
 0x6ad   : > { %v2023_v42 = vpop.f32.mrb[5].mxu0  ;;  %v1684_v30 = vmul.f32 %v1608_v38, %v1608_v38 }
 0x6ae   : > { %v1680_v26 = vpop.f32.mrb[4].mxu1 }
 0x6af   : > { %v1685_v27 = vmul.f32 %v1680_v26, %v1680_v26  ;;  %v2028_v45 = vpop.f32.mrb[5].mxu1 }
 0x6b1   : > { %v1688_v28 = vrot.slane %v1685_v27, 7 }
 0x6b3   : > { %v1690_v31 = vsel %vm1689_vm8, %v1688_v28, %v1684_v30 }
 0x6b4   : > { %v1693_v32 = vsel %vm1692_vm9, %v1690_v31, 0.0 }
 0x6b5   : > { %1694 = vadd.xlane.f32.xlu0 %v1693_v32 }
 0x742   : > { %v1695_v33 = vpop.xlane.xlu0 %1694 }
 0x743   : > { %v1696_v34 = vmax.f32 %v1695_v33, 1e-24 }
 0x745   : > { %2316 = vrsqrt.f32 %v1696_v34 }
 0x74f   : > { %v2317_v35 = vpop.eup %2316 }
 0x750   : > { %v1699_v36 = vrot.slane %v2317_v35, 1  ;;  %v1702_v39 = vmul.f32 %v2317_v35, %v1608_v38 }
 0x752   : > { %v1703_v37 = vmul.f32 %v1699_v36, %v1680_v26 }
 0x754   : > { %v1706_v40 = vrot.slane %v1703_v37, 7 }
 0x756   : > { %v1707_v41 = vsel %vm1689_vm8, %v1706_v40, %v1702_v39 }
 0x757   : > { %1709 = vst [vmem:[%s2961_s12] sm:$0x3] %v1707_v41 }
 0x758 PF: > { %s3148_s7 = sld [smem:[#allocation26_spill]]  ;;  %s3149_s19 = sld [smem:[#allocation31_spill]] }
 0x759   : > { %s3150_s8 = sld [smem:[#allocation36_spill]]  ;;  %s1724_s9 = sshll.u32 %s2961_s12, 4  ;;  %s1725_s9 = int_to_ptr.vmem [resolvable:$true] %s1724_s9 }
 0x75a   : > { %s1711_s16 = scalar_lea.sflag [#allocation5], %s414_s21  ;;  %s2458_s22 = scalar_lea.vmem %s1725_s9, 32 }
 0x75b   : > { %p2459_p5 = scmp.ne.s32.totalorder %s1725_s9, %s2458_s22  ;;  %s2614_s2 = smov [#allocation14]  }
 0x75c   : > { %s2462_s18 = sshll.u32 %s2614_s2, 4  ;;  %s2463_s18 = int_to_ptr.vmem [resolvable:$false] %s2462_s18 }
 0x75d   : > { %s2464_s20 = scalar_lea.vmem %s2463_s18, 64  ;;  %p2465_p0 = scmp.lt.s32.totalorder %s1725_s9, %s2463_s18 }
 0x75e   : > { %s1966_s15 = sshll.u32 %s3148_s7, 5  ;;  %p3152_p7 = scmp.ne.s32.totalorder %s3149_s19, 0 }
 0x75f   : > { %s3151_s14 = smov %s3150_s8  ;;  %s3028_s23 = scalar_lea.hbm %s3150_s8, %s1966_s15 }
 0x760   : > { %p2460_p13 = pnand %p2459_p5, %p3152_p7  ;;  %p2466_p11 = scmp.lt.s32.totalorder %s2464_s20, %s2458_s22 }
 0x762   : > { %p2461_p3 = pneg %p2460_p13  ;;  %p2467_p9 = por %p2466_p11, %p2465_p0 }
 0x764   : > { %p2468_p1 = pnand %p2467_p9, %p2461_p3 }
 0x766   : > { %2471 = shalt.err (!%p2468_p1)
}
 0x767   : > { %s2472_s21 = scalar_lea.hbm %s3028_s23, 32  ;;  %s2476_s27 = scalar_lea.hbm %s3151_s14, 64 }
 0x768   : > { %p2473_p2 = scmp.ne.s32.totalorder %s3028_s23, %s2472_s21  ;;  %p2477_p8 = scmp.lt.u32.totalorder %s3028_s23, %s3151_s14 }
 0x769   : > { %p2478_p10 = scmp.lt.u32.totalorder %s2476_s27, %s2472_s21  ;;  %p2480_p5 = scmp.lt.u32.totalorder %s2472_s21, %s3028_s23 }
 0x76a   : > { %p2474_p6 = pnand %p2473_p2, %p3152_p7 }
 0x76b   : > { %p2479_p12 = por %p2478_p10, %p2477_p8 }
 0x76c   : > { %p2475_p4 = pneg %p2474_p6 }
 0x76d   : > { %p2481_p13 = por %p2480_p5, %p2479_p12 }
 0x76f   : > { %p2482_p3 = pnand %p2481_p13, %p2475_p4 }
 0x771   : > { %2485 = shalt.err (!%p2482_p3)
}
 0x772   : > { %2058 = dma.vmem_to_hbm [thread:$0]  (%p3152_p7), %s1725_s9, 32, %s3028_s23, %s1711_s16  }
 0x773 PF: > { %s3153_s13 = sld [smem:[#allocation23_spill]]  ;;  %s3154_s7 = sld [smem:[#allocation34_spill]] }
 0x774   : > { %p2090_p0 = scmp.ge.s32.totalorder %s2592_s11, 2 }
 0x779   : > { %s1736_s15 = sand.u32 1, %s3153_s13   ;;  %p3155_p11 = scmp.ne.s32.totalorder %s3154_s7, 0 }
 0x77a   : > { %s1737_s26 = scalar_lea.sflag [#allocation5], %s1736_s15 }
 0x77b   : > { %p2077_p9 = pnand %p2090_p0, %p3155_p11 }
 0x77d   : > { %2547 = dma.done.wait (!%p2077_p9), %s1737_s26, 32  }
 0x77e   : > { %2549 = vsyncadd (!%p2077_p9), %s1737_s26, 4294967264  ;;  %s26_s11 = sadd.s32 1, %s2592_s11   ;;  %s3156_s10 = sld [smem:[#allocation24_spill]] }
 0x77f   : > { %p23_p1 = scmp.ge.s32.totalorder %s26_s11, 6   ;;  %s3157_s26 = sld [smem:[#allocation32_spill]] }
 0x780   : > { %s3158_s19 = sld [smem:[#allocation33_spill]]  ;;  %s3159_s30 = sld [smem:[#allocation27_spill]] }
 0x781   : > { %s3160_s8 = sld [smem:[#allocation28_spill]]  ;;  %s3161_s9 = sld [smem:[#allocation29_spill]] }
 0x782   : > { %s3162_s23 = sld [smem:[#allocation30_spill]]  ;;  %s3163_s24 = smov %s2556_s25 }
 0x783   : > { %s3165_s27 = smov %s2568_s28  ;;  %s3166_s28 = smov %s2572_s29 }
 0x784   : > { %s3164_s25 = smov %s3156_s10  ;;  %25 = sbr.rel (!%p23_p1) target bundleno = 15 (0xf), region = 138 }
 0x786   : > { %s3167_s29 = smov %s3158_s19 }
 0x788   : > { %s3168_s10 = smov %s3162_s23 }
 0x78b   :  { %1742 = vsyncpa [#allocation4], 1 }
 0x78c   :  { %1744 = vsyncpa [#allocation4 + $0x1], 1 }
 0x78d   :  { %1745 = vsyncpa [#allocation7], 1 }
 0x78e   :  { %1746 = vsyncpa [#allocation10], 1 }
 0x78f   :  { %1747 = vsyncpa [#allocation13], 1 }
 0x790   :  { %1748 = vsyncpa [#allocation5], 1 }
 0x791   :  { %1750 = vsyncpa [#allocation5 + $0x1], 1 }

</bundles_post_ra>
